<compile_context>
chip_gen: v7x
topology: tpu7x:2x2x1
jax: 0.10.0
libtpu: 0.0.40
codegen_flags: <defaults>
</compile_context>

<pallas_src>
import jax
import jax.numpy as jnp
from jax import lax
from jax.experimental import pallas as pl
from jax.experimental.pallas import tpu as pltpu

EPS = 1e-5
_VMEM_LIMIT = 32 * 1024 * 1024          # safe on v5e / v6e / v7x


def _fold_bn(gamma, beta, mean, var):
    scale = gamma / jnp.sqrt(var + EPS)
    return scale, beta - mean * scale


def _choose_tph(Hp, W, Cin, Cout, budget_bytes=2 << 20):
    """Pooled output rows per grid step, chosen by a VMEM byte budget."""
    def live_bytes(t):
        rows = 2 * t
        return 4 * ((rows + 2) * W * Cout     # t0 scratch
                    + rows * W * Cout         # conv1 rows
                    + rows * W * Cin          # branch-A x rows
                    + 4 * t * (W // 2) * Cout)  # pooled/out temps (+buffers)
    if live_bytes(Hp) <= budget_bytes:
        return Hp                              # whole image per batch step
    cands = [t for t in range(8, Hp, 8)        # tph % 8 == 0 keeps out-spec legal
             if Hp % t == 0 and live_bytes(t) <= budget_bytes]
    return max(cands) if cands else Hp


def _banded_conv_matrices(w0, w1, w1x1_2d, W, Cin, Cout):
    """Build the lane-dense banded weight matrices (wrapper-side, once)."""
    Wp = W // 2
    f32 = jnp.float32
    dx = jnp.arange(3)
    wi = jnp.arange(W)
    wo = jnp.arange(W)
    # conv0: rows index (wi, cin) of a dense x row, cols index (w, cout).
    s0 = (wi[None, :, None] == wo[None, None, :] + dx[:, None, None] - 1).astype(f32)
    A = jnp.einsum("xiw,ocyx->yicwo", s0, w0).reshape(3, W * Cin, W * Cout)
    # conv1: output columns permuted to (pair, wp, cout) so the width-pair max
    # of the 2x2 pool becomes max(y[:, :Wp*Cout], y[:, Wp*Cout:]).
    p = jnp.arange(2)
    wp = jnp.arange(Wp)
    s1 = (wi[None, :, None, None] ==
          2 * wp[None, None, None, :] + p[None, None, :, None]
          + dx[:, None, None, None] - 1).astype(f32)
    B = jnp.einsum("xipw,ocyx->yicpwo", s1, w1).reshape(3, W * Cout, W * Cout)
    # 1x1 conv applied to the width-pair-maxed x row: only even width groups of
    # the input carry valid data; odd groups get zero rows (MXU compacts).
    K = (W - 1) * Cin
    k = jnp.arange(K)
    sel = (k[:, None] // Cin == 2 * wp[None, :]).astype(f32)    # (K, Wp)
    w_per_k = w1x1_2d[:, k % Cin].T                             # (K, Cout)
    D = (sel[:, :, None] * w_per_k[:, None, :]).reshape(K, Wp * Cout)
    return A, B, D


def _make_fused_kernel(H, W, Cin, Cout, tph):
    Wp = W // 2
    rows = 2 * tph            # un-pooled image rows handled per grid step
    zrows = rows + 2          # t0 rows incl. +-1 halo for conv1

    def kernel(x_ref, a_ref, bmat_ref, d_ref,
               b0_ref, sc0_ref, sh0_ref, b1_ref, sc1_ref, sh1_ref, ba_ref,
               o_ref, z_ref):
        i = pl.program_id(1)
        r0 = pl.multiple_of(i * rows, rows)     # first image row of this chunk

        # ---- conv0 + relu + bn0 : 3 banded matmuls on lane-dense rows -------
        acc = None
        for dy in range(3):                     # padded x rows r0+dy ...
            xs = x_ref[pl.ds(r0 + dy, zrows), :]            # (zrows, W*Cin)
            d = jnp.dot(xs, a_ref[dy], preferred_element_type=jnp.float32)
            acc = d if acc is None else acc + d
        z = jnp.maximum(acc + b0_ref[...], 0.0) * sc0_ref[...] + sh0_ref[...]
        # zero t0 rows that fall outside the image (conv1 'same' zero padding)
        img_row = lax.broadcasted_iota(jnp.int32, (zrows, 1), 0) + (r0 - 1)
        z = z * ((img_row >= 0) & (img_row < H)).astype(jnp.float32)
        z_ref[...] = z

        # ---- conv1 : banded matmuls, output lanes ordered (pair, wp, cout) --
        y = None
        for dy in range(3):
            d = jnp.dot(z_ref[dy:dy + rows, :], bmat_ref[dy],
                        preferred_element_type=jnp.float32)
            y = d if y is None else y + d
        y = y + b1_ref[...]                                  # (rows, W*Cout)

        # ---- branch B : maxpool 2x2 -> relu -> bn1 ---------------------------
        yb = y.reshape(tph, 2, W * Cout)
        yr = jnp.maximum(yb[:, 0], yb[:, 1])                 # row pairs
        pb = jnp.maximum(yr[:, :Wp * Cout], yr[:, Wp * Cout:])  # width pairs
        out_b = jnp.maximum(pb, 0.0) * sc1_ref[...] + sh1_ref[...]

        # ---- branch A : maxpool(X) -> conv1x1 --------------------------------
        xa = x_ref[pl.ds(r0 + 2, rows), :]                   # image rows of chunk
        xab = xa.reshape(tph, 2, W * Cin)
        xr = jnp.maximum(xab[:, 0], xab[:, 1])               # row pairs
        # width pairs: valid values land at even width groups; odd groups are
        # ignored because the matching rows of D are zero.
        xc = jnp.maximum(xr[:, :(W - 1) * Cin], xr[:, Cin:])
        out_a = jnp.dot(xc, d_ref[...],
                        preferred_element_type=jnp.float32) + ba_ref[...]

        o_ref[...] = (out_a + out_b).astype(o_ref.dtype)

    return kernel


@jax.jit
def subsample_block_forward(x_nchw, params):
    N, Cin, H, W = x_nchw.shape
    Cout = params["w0"].shape[0]
    assert H % 2 == 0 and W % 2 == 0, "even H/W required (2x2 maxpool)"
    assert W <= 64, "banded-matrix path sized for small (digits-net) widths"
    Hp, Wp = H // 2, W // 2

    x = jnp.transpose(x_nchw, (0, 2, 3, 1))                  # NCHW -> NHWC
    # one zero-pad copy (2 rows top/bottom); column padding is folded into A/B.
    xpd = jnp.pad(x, ((0, 0), (2, 2), (0, 0), (0, 0))).reshape(N, H + 4, W * Cin)

    sc0, sh0 = _fold_bn(params["bn0_gamma"], params["bn0_beta"],
                        params["bn0_mean"], params["bn0_var"])
    sc1, sh1 = _fold_bn(params["bn1_gamma"], params["bn1_beta"],
                        params["bn1_mean"], params["bn1_var"])
    w1x1_2d = params["w1x1"].reshape(Cout, Cin)
    A, B, D = _banded_conv_matrices(params["w0"], params["w1"], w1x1_2d,
                                    W, Cin, Cout)

    b0_d = jnp.tile(params["b0"], W).reshape(1, W * Cout)
    sc0_d = jnp.tile(sc0, W).reshape(1, W * Cout)
    sh0_d = jnp.tile(sh0, W).reshape(1, W * Cout)
    b1_d = jnp.tile(params["b1"], W).reshape(1, W * Cout)
    sc1_d = jnp.tile(sc1, Wp).reshape(1, Wp * Cout)
    sh1_d = jnp.tile(sh1, Wp).reshape(1, Wp * Cout)
    ba_d = jnp.tile(params["b1x1"], Wp).reshape(1, Wp * Cout)

    tph = _choose_tph(Hp, W, Cin, Cout)
    nchunks = Hp // tph

    out = pl.pallas_call(
        _make_fused_kernel(H, W, Cin, Cout, tph),
        out_shape=jax.ShapeDtypeStruct((N, Hp, Wp * Cout), x.dtype),
        grid=(N, nchunks),
        in_specs=[
            # whole padded, lane-dense image per batch element (reused over chunks)
            pl.BlockSpec((None, H + 4, W * Cin), lambda n, i: (n, 0, 0)),
            pl.BlockSpec((3, W * Cin, W * Cout), lambda n, i: (0, 0, 0)),
            pl.BlockSpec((3, W * Cout, W * Cout), lambda n, i: (0, 0, 0)),
            pl.BlockSpec(((W - 1) * Cin, Wp * Cout), lambda n, i: (0, 0)),
            pl.BlockSpec((1, W * Cout), lambda n, i: (0, 0)),
            pl.BlockSpec((1, W * Cout), lambda n, i: (0, 0)),
            pl.BlockSpec((1, W * Cout), lambda n, i: (0, 0)),
            pl.BlockSpec((1, W * Cout), lambda n, i: (0, 0)),
            pl.BlockSpec((1, Wp * Cout), lambda n, i: (0, 0)),
            pl.BlockSpec((1, Wp * Cout), lambda n, i: (0, 0)),
            pl.BlockSpec((1, Wp * Cout), lambda n, i: (0, 0)),
        ],
        out_specs=pl.BlockSpec((None, tph, Wp * Cout), lambda n, i: (n, i, 0)),
        scratch_shapes=[pltpu.VMEM((2 * tph + 2, W * Cout), jnp.float32)],
        compiler_params=pltpu.CompilerParams(
            dimension_semantics=("parallel", "parallel"),
            vmem_limit_bytes=_VMEM_LIMIT),
    )(xpd, A, B, D, b0_d, sc0_d, sh0_d, b1_d, sc1_d, sh1_d, ba_d)

    out = out.reshape(N, Hp, Wp, Cout)                        # free (row-major)
    return jnp.transpose(out, (0, 3, 1, 2))                   # NHWC -> NCHW


# ---------------------------------------------------------------------------
# Pure-JAX reference (sanity check)
# ---------------------------------------------------------------------------
def reference_forward(x_nchw, params):
    x = jnp.transpose(x_nchw, (0, 2, 3, 1))

    def conv3x3(t, w, b):
        w_hwio = jnp.transpose(w, (2, 3, 1, 0))
        return lax.conv_general_dilated(
            t, w_hwio, (1, 1), "SAME",
            dimension_numbers=("NHWC", "HWIO", "NHWC"),
            precision=lax.Precision.HIGHEST) + b

    def bn(t, g, b, m, v):
        return (t - m) / jnp.sqrt(v + EPS) * g + b

    def maxpool(t):
        return lax.reduce_window(t, -jnp.inf, lax.max,
                                 (1, 2, 2, 1), (1, 2, 2, 1), "VALID")

    t = bn(jax.nn.relu(conv3x3(x, params["w0"], params["b0"])),
           params["bn0_gamma"], params["bn0_beta"],
           params["bn0_mean"], params["bn0_var"])
    t = conv3x3(t, params["w1"], params["b1"])
    branch_b = bn(jax.nn.relu(maxpool(t)),
                  params["bn1_gamma"], params["bn1_beta"],
                  params["bn1_mean"], params["bn1_var"])

    cout, cin = params["w1x1"].shape[:2]
    xp = maxpool(x)
    branch_a = jnp.einsum("nhwc,cd->nhwd", xp,
                          params["w1x1"].reshape(cout, cin).T,
                          precision=lax.Precision.HIGHEST) + params["b1x1"]
    return jnp.transpose(branch_a + branch_b, (0, 3, 1, 2))


# ---------------------------------------------------------------------------
if __name__ == "__main__":
    N, Cin, Cout, H, W = 2, 4, 8, 16, 16

    key = jax.random.PRNGKey(0)
    ks = jax.random.split(key, 16)
    params = {
        "w0": jax.random.normal(ks[0], (Cout, Cin, 3, 3), jnp.float32) * 0.1,
        "b0": jax.random.normal(ks[1], (Cout,), jnp.float32) * 0.05,
        "w1": jax.random.normal(ks[2], (Cout, Cout, 3, 3), jnp.float32) * 0.1,
        "b1": jax.random.normal(ks[3], (Cout,), jnp.float32) * 0.05,
        "w1x1": jax.random.normal(ks[4], (Cout, Cin, 1, 1), jnp.float32) * 0.1,
        "b1x1": jax.random.normal(ks[5], (Cout,), jnp.float32) * 0.05,
        "bn0_gamma": 1.0 + 0.1 * jax.random.normal(ks[6], (Cout,), jnp.float32),
        "bn0_beta": 0.05 * jax.random.normal(ks[7], (Cout,), jnp.float32),
        "bn0_mean": 0.1 * jax.random.normal(ks[8], (Cout,), jnp.float32),
        "bn0_var": jax.random.uniform(ks[9], (Cout,), jnp.float32, 0.5, 1.5),
        "bn1_gamma": 1.0 + 0.1 * jax.random.normal(ks[10], (Cout,), jnp.float32),
        "bn1_beta": 0.05 * jax.random.normal(ks[11], (Cout,), jnp.float32),
        "bn1_mean": 0.1 * jax.random.normal(ks[12], (Cout,), jnp.float32),
        "bn1_var": jax.random.uniform(ks[13], (Cout,), jnp.float32, 0.5, 1.5),
    }
    x = jax.random.normal(ks[14], (N, Cin, H, W), jnp.float32)

    out = jax.block_until_ready(subsample_block_forward(x, params))
    assert out.shape == (N, Cout, H // 2, W // 2), out.shape

    ref = jax.block_until_ready(reference_forward(x, params))
    err = float(jnp.max(jnp.abs(out - ref)))
    assert jnp.allclose(out, ref, rtol=1e-2, atol=1e-2), err

    print("KERNEL_OK")
</pallas_src>

<mosaic_0001>
module attributes {stable_mosaic.version = 11 : i64} {
  func.func @kernel(%arg0: i32, %arg1: i32, %arg2: memref<1x20x64xf32, #tpu.memory_space<vmem>>, %arg3: memref<3x64x128xf32, #tpu.memory_space<vmem>>, %arg4: memref<3x128x128xf32, #tpu.memory_space<vmem>>, %arg5: memref<60x64xf32, #tpu.memory_space<vmem>>, %arg6: memref<1x128xf32, #tpu.memory_space<vmem>>, %arg7: memref<1x128xf32, #tpu.memory_space<vmem>>, %arg8: memref<1x128xf32, #tpu.memory_space<vmem>>, %arg9: memref<1x128xf32, #tpu.memory_space<vmem>>, %arg10: memref<1x64xf32, #tpu.memory_space<vmem>>, %arg11: memref<1x64xf32, #tpu.memory_space<vmem>>, %arg12: memref<1x64xf32, #tpu.memory_space<vmem>>, %arg13: memref<1x8x64xf32, #tpu.memory_space<vmem>>, %arg14: memref<18x128xf32, #tpu.memory_space<vmem>>) attributes {dimension_semantics = [#tpu.dimension_semantics<parallel>, #tpu.dimension_semantics<parallel>], iteration_bounds = array<i64: 2, 1>, scalar_prefetch = 0 : i64, scratch_operands = 1 : i64, tpu.core_type = #tpu.core_type<tc>, window_params = [{transform_indices = @transform_0, window_bounds = array<i64: 1, 20, 64>}, {pipeline_mode = #tpu.pipeline_mode<synchronous>, transform_indices = @transform_1, window_bounds = array<i64: 3, 64, 128>}, {pipeline_mode = #tpu.pipeline_mode<synchronous>, transform_indices = @transform_2, window_bounds = array<i64: 3, 128, 128>}, {pipeline_mode = #tpu.pipeline_mode<synchronous>, transform_indices = @transform_3, window_bounds = array<i64: 60, 64>}, {pipeline_mode = #tpu.pipeline_mode<synchronous>, transform_indices = @transform_4, window_bounds = array<i64: 1, 128>}, {pipeline_mode = #tpu.pipeline_mode<synchronous>, transform_indices = @transform_5, window_bounds = array<i64: 1, 128>}, {pipeline_mode = #tpu.pipeline_mode<synchronous>, transform_indices = @transform_6, window_bounds = array<i64: 1, 128>}, {pipeline_mode = #tpu.pipeline_mode<synchronous>, transform_indices = @transform_7, window_bounds = array<i64: 1, 128>}, {pipeline_mode = #tpu.pipeline_mode<synchronous>, transform_indices = @transform_8, window_bounds = array<i64: 1, 64>}, {pipeline_mode = #tpu.pipeline_mode<synchronous>, transform_indices = @transform_9, window_bounds = array<i64: 1, 64>}, {pipeline_mode = #tpu.pipeline_mode<synchronous>, transform_indices = @transform_10, window_bounds = array<i64: 1, 64>}, {transform_indices = @transform_11, window_bounds = array<i64: 1, 8, 64>}]} {
    %c16_i32 = arith.constant 16 : i32
    %0 = arith.muli %arg1, %c16_i32 : i32
    %1 = tpu.assume_multiple %0, 16 : i32
    %c0_i32 = arith.constant 0 : i32
    %2 = arith.addi %1, %c0_i32 : i32
    %c0 = arith.constant 0 : index
    %3 = arith.index_cast %2 : i32 to index
    %c0_0 = arith.constant 0 : index
    %4 = vector.load %arg2[%c0, %3, %c0_0] : memref<1x20x64xf32, #tpu.memory_space<vmem>>, vector<1x18x64xf32>
    %5 = vector.shape_cast %4 : vector<1x18x64xf32> to vector<18x64xf32>
    %c0_1 = arith.constant 0 : index
    %c0_2 = arith.constant 0 : index
    %c0_3 = arith.constant 0 : index
    %6 = vector.load %arg3[%c0_1, %c0_2, %c0_3] : memref<3x64x128xf32, #tpu.memory_space<vmem>>, vector<1x64x128xf32>
    %7 = vector.shape_cast %6 : vector<1x64x128xf32> to vector<64x128xf32>
    %cst = arith.constant dense<0.000000e+00> : vector<18x128xf32>
    %8 = tpu.matmul %5, %7, %cst {dimension_numbers = #tpu.dot_dimension_numbers<[1], [0], [0], [1], [0, 0, 1, 1], [], []>} : vector<18x64xf32>, vector<64x128xf32>, vector<18x128xf32> -> vector<18x128xf32>
    %c1_i32 = arith.constant 1 : i32
    %9 = arith.addi %1, %c1_i32 : i32
    %c0_4 = arith.constant 0 : index
    %10 = arith.index_cast %9 : i32 to index
    %c0_5 = arith.constant 0 : index
    %11 = vector.load %arg2[%c0_4, %10, %c0_5] : memref<1x20x64xf32, #tpu.memory_space<vmem>>, vector<1x18x64xf32>
    %12 = vector.shape_cast %11 : vector<1x18x64xf32> to vector<18x64xf32>
    %c1 = arith.constant 1 : index
    %c0_6 = arith.constant 0 : index
    %c0_7 = arith.constant 0 : index
    %13 = vector.load %arg3[%c1, %c0_6, %c0_7] : memref<3x64x128xf32, #tpu.memory_space<vmem>>, vector<1x64x128xf32>
    %14 = vector.shape_cast %13 : vector<1x64x128xf32> to vector<64x128xf32>
    %cst_8 = arith.constant dense<0.000000e+00> : vector<18x128xf32>
    %15 = tpu.matmul %12, %14, %cst_8 {dimension_numbers = #tpu.dot_dimension_numbers<[1], [0], [0], [1], [0, 0, 1, 1], [], []>} : vector<18x64xf32>, vector<64x128xf32>, vector<18x128xf32> -> vector<18x128xf32>
    %16 = arith.addf %8, %15 : vector<18x128xf32>
    %c2_i32 = arith.constant 2 : i32
    %17 = arith.addi %1, %c2_i32 : i32
    %c0_9 = arith.constant 0 : index
    %18 = arith.index_cast %17 : i32 to index
    %c0_10 = arith.constant 0 : index
    %19 = vector.load %arg2[%c0_9, %18, %c0_10] : memref<1x20x64xf32, #tpu.memory_space<vmem>>, vector<1x18x64xf32>
    %20 = vector.shape_cast %19 : vector<1x18x64xf32> to vector<18x64xf32>
    %c2 = arith.constant 2 : index
    %c0_11 = arith.constant 0 : index
    %c0_12 = arith.constant 0 : index
    %21 = vector.load %arg3[%c2, %c0_11, %c0_12] : memref<3x64x128xf32, #tpu.memory_space<vmem>>, vector<1x64x128xf32>
    %22 = vector.shape_cast %21 : vector<1x64x128xf32> to vector<64x128xf32>
    %cst_13 = arith.constant dense<0.000000e+00> : vector<18x128xf32>
    %23 = tpu.matmul %20, %22, %cst_13 {dimension_numbers = #tpu.dot_dimension_numbers<[1], [0], [0], [1], [0, 0, 1, 1], [], []>} : vector<18x64xf32>, vector<64x128xf32>, vector<18x128xf32> -> vector<18x128xf32>
    %24 = arith.addf %16, %23 : vector<18x128xf32>
    %c0_14 = arith.constant 0 : index
    %c0_15 = arith.constant 0 : index
    %25 = vector.load %arg6[%c0_14, %c0_15] : memref<1x128xf32, #tpu.memory_space<vmem>>, vector<1x128xf32>
    %26 = vector.broadcast %25 : vector<1x128xf32> to vector<18x128xf32>
    %27 = arith.addf %24, %26 : vector<18x128xf32>
    %cst_16 = arith.constant 0.000000e+00 : f32
    %28 = vector.broadcast %cst_16 : f32 to vector<18x128xf32>
    %29 = arith.maximumf %27, %28 : vector<18x128xf32>
    %c0_17 = arith.constant 0 : index
    %c0_18 = arith.constant 0 : index
    %30 = vector.load %arg7[%c0_17, %c0_18] : memref<1x128xf32, #tpu.memory_space<vmem>>, vector<1x128xf32>
    %31 = vector.broadcast %30 : vector<1x128xf32> to vector<18x128xf32>
    %32 = arith.mulf %29, %31 : vector<18x128xf32>
    %c0_19 = arith.constant 0 : index
    %c0_20 = arith.constant 0 : index
    %33 = vector.load %arg8[%c0_19, %c0_20] : memref<1x128xf32, #tpu.memory_space<vmem>>, vector<1x128xf32>
    %34 = vector.broadcast %33 : vector<1x128xf32> to vector<18x128xf32>
    %35 = arith.addf %32, %34 : vector<18x128xf32>
    %36 = tpu.iota {dimensions = array<i32: 0>} : vector<18x1xi32>
    %c1_i32_21 = arith.constant 1 : i32
    %37 = arith.subi %1, %c1_i32_21 : i32
    %38 = vector.broadcast %37 : i32 to vector<18x1xi32>
    %39 = arith.addi %36, %38 : vector<18x1xi32>
    %c0_i32_22 = arith.constant 0 : i32
    %40 = vector.broadcast %c0_i32_22 : i32 to vector<18x1xi32>
    %41 = arith.cmpi sge, %39, %40 : vector<18x1xi32>
    %c16_i32_23 = arith.constant 16 : i32
    %42 = vector.broadcast %c16_i32_23 : i32 to vector<18x1xi32>
    %43 = arith.cmpi slt, %39, %42 : vector<18x1xi32>
    %44 = arith.andi %41, %43 : vector<18x1xi1>
    %45 = arith.extui %44 : vector<18x1xi1> to vector<18x1xi32>
    %46 = arith.sitofp %45 : vector<18x1xi32> to vector<18x1xf32>
    %47 = vector.broadcast %46 : vector<18x1xf32> to vector<18x128xf32>
    %48 = arith.mulf %35, %47 : vector<18x128xf32>
    %c0_24 = arith.constant 0 : index
    %c0_25 = arith.constant 0 : index
    %49 = vector.load %arg14[%c0_24, %c0_25] : memref<18x128xf32, #tpu.memory_space<vmem>>, vector<18x128xf32>
    tpu.vector_store %arg14[%c0_24, %c0_25], %48 {strides = array<i32>} : memref<18x128xf32, #tpu.memory_space<vmem>>, vector<18x128xf32>,
    %c0_26 = arith.constant 0 : index
    %c0_27 = arith.constant 0 : index
    %50 = vector.load %arg14[%c0_26, %c0_27] : memref<18x128xf32, #tpu.memory_space<vmem>>, vector<16x128xf32>
    %c0_28 = arith.constant 0 : index
    %c0_29 = arith.constant 0 : index
    %c0_30 = arith.constant 0 : index
    %51 = vector.load %arg4[%c0_28, %c0_29, %c0_30] : memref<3x128x128xf32, #tpu.memory_space<vmem>>, vector<1x128x128xf32>
    %52 = vector.shape_cast %51 : vector<1x128x128xf32> to vector<128x128xf32>
    %cst_31 = arith.constant dense<0.000000e+00> : vector<16x128xf32>
    %53 = tpu.matmul %50, %52, %cst_31 {dimension_numbers = #tpu.dot_dimension_numbers<[1], [0], [0], [1], [0, 0, 1, 1], [], []>} : vector<16x128xf32>, vector<128x128xf32>, vector<16x128xf32> -> vector<16x128xf32>
    %c1_32 = arith.constant 1 : index
    %c0_33 = arith.constant 0 : index
    %54 = vector.load %arg14[%c1_32, %c0_33] : memref<18x128xf32, #tpu.memory_space<vmem>>, vector<16x128xf32>
    %c1_34 = arith.constant 1 : index
    %c0_35 = arith.constant 0 : index
    %c0_36 = arith.constant 0 : index
    %55 = vector.load %arg4[%c1_34, %c0_35, %c0_36] : memref<3x128x128xf32, #tpu.memory_space<vmem>>, vector<1x128x128xf32>
    %56 = vector.shape_cast %55 : vector<1x128x128xf32> to vector<128x128xf32>
    %cst_37 = arith.constant dense<0.000000e+00> : vector<16x128xf32>
    %57 = tpu.matmul %54, %56, %cst_37 {dimension_numbers = #tpu.dot_dimension_numbers<[1], [0], [0], [1], [0, 0, 1, 1], [], []>} : vector<16x128xf32>, vector<128x128xf32>, vector<16x128xf32> -> vector<16x128xf32>
    %58 = arith.addf %53, %57 : vector<16x128xf32>
    %c2_38 = arith.constant 2 : index
    %c0_39 = arith.constant 0 : index
    %59 = vector.load %arg14[%c2_38, %c0_39] : memref<18x128xf32, #tpu.memory_space<vmem>>, vector<16x128xf32>
    %c2_40 = arith.constant 2 : index
    %c0_41 = arith.constant 0 : index
    %c0_42 = arith.constant 0 : index
    %60 = vector.load %arg4[%c2_40, %c0_41, %c0_42] : memref<3x128x128xf32, #tpu.memory_space<vmem>>, vector<1x128x128xf32>
    %61 = vector.shape_cast %60 : vector<1x128x128xf32> to vector<128x128xf32>
    %cst_43 = arith.constant dense<0.000000e+00> : vector<16x128xf32>
    %62 = tpu.matmul %59, %61, %cst_43 {dimension_numbers = #tpu.dot_dimension_numbers<[1], [0], [0], [1], [0, 0, 1, 1], [], []>} : vector<16x128xf32>, vector<128x128xf32>, vector<16x128xf32> -> vector<16x128xf32>
    %63 = arith.addf %58, %62 : vector<16x128xf32>
    %c0_44 = arith.constant 0 : index
    %c0_45 = arith.constant 0 : index
    %64 = vector.load %arg9[%c0_44, %c0_45] : memref<1x128xf32, #tpu.memory_space<vmem>>, vector<1x128xf32>
    %65 = vector.broadcast %64 : vector<1x128xf32> to vector<16x128xf32>
    %66 = arith.addf %63, %65 : vector<16x128xf32>
    %67 = vector.shape_cast %66 : vector<16x128xf32> to vector<8x2x128xf32>
    %68 = vector.extract_strided_slice %67 {offsets = [0, 0, 0], sizes = [8, 1, 128], strides = [1, 1, 1]} : vector<8x2x128xf32> to vector<8x1x128xf32>
    %69 = vector.shape_cast %68 : vector<8x1x128xf32> to vector<8x128xf32>
    %70 = vector.extract_strided_slice %67 {offsets = [0, 1, 0], sizes = [8, 1, 128], strides = [1, 1, 1]} : vector<8x2x128xf32> to vector<8x1x128xf32>
    %71 = vector.shape_cast %70 : vector<8x1x128xf32> to vector<8x128xf32>
    %72 = arith.maximumf %69, %71 : vector<8x128xf32>
    %73 = vector.extract_strided_slice %72 {offsets = [0, 0], sizes = [8, 64], strides = [1, 1]} : vector<8x128xf32> to vector<8x64xf32>
    %74 = vector.extract_strided_slice %72 {offsets = [0, 64], sizes = [8, 64], strides = [1, 1]} : vector<8x128xf32> to vector<8x64xf32>
    %75 = arith.maximumf %73, %74 : vector<8x64xf32>
    %cst_46 = arith.constant 0.000000e+00 : f32
    %76 = vector.broadcast %cst_46 : f32 to vector<8x64xf32>
    %77 = arith.maximumf %75, %76 : vector<8x64xf32>
    %c0_47 = arith.constant 0 : index
    %c0_48 = arith.constant 0 : index
    %78 = vector.load %arg10[%c0_47, %c0_48] : memref<1x64xf32, #tpu.memory_space<vmem>>, vector<1x64xf32>
    %79 = vector.broadcast %78 : vector<1x64xf32> to vector<8x64xf32>
    %80 = arith.mulf %77, %79 : vector<8x64xf32>
    %c0_49 = arith.constant 0 : index
    %c0_50 = arith.constant 0 : index
    %81 = vector.load %arg11[%c0_49, %c0_50] : memref<1x64xf32, #tpu.memory_space<vmem>>, vector<1x64xf32>
    %82 = vector.broadcast %81 : vector<1x64xf32> to vector<8x64xf32>
    %83 = arith.addf %80, %82 : vector<8x64xf32>
    %c2_i32_51 = arith.constant 2 : i32
    %84 = arith.addi %1, %c2_i32_51 : i32
    %c0_52 = arith.constant 0 : index
    %85 = arith.index_cast %84 : i32 to index
    %c0_53 = arith.constant 0 : index
    %86 = vector.load %arg2[%c0_52, %85, %c0_53] : memref<1x20x64xf32, #tpu.memory_space<vmem>>, vector<1x16x64xf32>
    %87 = vector.shape_cast %86 : vector<1x16x64xf32> to vector<16x64xf32>
    %88 = vector.shape_cast %87 : vector<16x64xf32> to vector<8x2x64xf32>
    %89 = vector.extract_strided_slice %88 {offsets = [0, 0, 0], sizes = [8, 1, 64], strides = [1, 1, 1]} : vector<8x2x64xf32> to vector<8x1x64xf32>
    %90 = vector.shape_cast %89 : vector<8x1x64xf32> to vector<8x64xf32>
    %91 = vector.extract_strided_slice %88 {offsets = [0, 1, 0], sizes = [8, 1, 64], strides = [1, 1, 1]} : vector<8x2x64xf32> to vector<8x1x64xf32>
    %92 = vector.shape_cast %91 : vector<8x1x64xf32> to vector<8x64xf32>
    %93 = arith.maximumf %90, %92 : vector<8x64xf32>
    %94 = vector.extract_strided_slice %93 {offsets = [0, 0], sizes = [8, 60], strides = [1, 1]} : vector<8x64xf32> to vector<8x60xf32>
    %95 = vector.extract_strided_slice %93 {offsets = [0, 4], sizes = [8, 60], strides = [1, 1]} : vector<8x64xf32> to vector<8x60xf32>
    %96 = arith.maximumf %94, %95 : vector<8x60xf32>
    %c0_54 = arith.constant 0 : index
    %c0_55 = arith.constant 0 : index
    %97 = vector.load %arg5[%c0_54, %c0_55] : memref<60x64xf32, #tpu.memory_space<vmem>>, vector<60x64xf32>
    %cst_56 = arith.constant dense<0.000000e+00> : vector<8x64xf32>
    %98 = tpu.matmul %96, %97, %cst_56 {dimension_numbers = #tpu.dot_dimension_numbers<[1], [0], [0], [1], [0, 0, 1, 1], [], []>} : vector<8x60xf32>, vector<60x64xf32>, vector<8x64xf32> -> vector<8x64xf32>
    %c0_57 = arith.constant 0 : index
    %c0_58 = arith.constant 0 : index
    %99 = vector.load %arg12[%c0_57, %c0_58] : memref<1x64xf32, #tpu.memory_space<vmem>>, vector<1x64xf32>
    %100 = vector.broadcast %99 : vector<1x64xf32> to vector<8x64xf32>
    %101 = arith.addf %98, %100 : vector<8x64xf32>
    %102 = arith.addf %101, %83 : vector<8x64xf32>
    %c0_59 = arith.constant 0 : index
    %c0_60 = arith.constant 0 : index
    %c0_61 = arith.constant 0 : index
    %103 = vector.load %arg13[%c0_59, %c0_60, %c0_61] : memref<1x8x64xf32, #tpu.memory_space<vmem>>, vector<1x8x64xf32>
    %104 = vector.shape_cast %103 : vector<1x8x64xf32> to vector<8x64xf32>
    %105 = vector.shape_cast %102 : vector<8x64xf32> to vector<1x8x64xf32>
    tpu.vector_store %arg13[%c0_59, %c0_60, %c0_61], %105 {strides = array<i32>} : memref<1x8x64xf32, #tpu.memory_space<vmem>>, vector<1x8x64xf32>,
    return
  }
  func.func @transform_0(%arg0: i32, %arg1: i32) -> (i32, i32, i32) {
    %c0_i32 = arith.constant 0 : i32
    %c0_i32_0 = arith.constant 0 : i32
    %c0_i32_1 = arith.constant 0 : i32
    return %arg0, %c0_i32, %c0_i32_0 : i32, i32, i32
  }
  func.func @transform_1(%arg0: i32, %arg1: i32) -> (i32, i32, i32) {
    %c0_i32 = arith.constant 0 : i32
    %c0_i32_0 = arith.constant 0 : i32
    %c0_i32_1 = arith.constant 0 : i32
    %c0_i32_2 = arith.constant 0 : i32
    return %c0_i32, %c0_i32_0, %c0_i32_1 : i32, i32, i32
  }
  func.func @transform_2(%arg0: i32, %arg1: i32) -> (i32, i32, i32) {
    %c0_i32 = arith.constant 0 : i32
    %c0_i32_0 = arith.constant 0 : i32
    %c0_i32_1 = arith.constant 0 : i32
    %c0_i32_2 = arith.constant 0 : i32
    return %c0_i32, %c0_i32_0, %c0_i32_1 : i32, i32, i32
  }
  func.func @transform_3(%arg0: i32, %arg1: i32) -> (i32, i32) {
    %c0_i32 = arith.constant 0 : i32
    %c0_i32_0 = arith.constant 0 : i32
    %c0_i32_1 = arith.constant 0 : i32
    return %c0_i32, %c0_i32_0 : i32, i32
  }
  func.func @transform_4(%arg0: i32, %arg1: i32) -> (i32, i32) {
    %c0_i32 = arith.constant 0 : i32
    %c0_i32_0 = arith.constant 0 : i32
    %c0_i32_1 = arith.constant 0 : i32
    return %c0_i32, %c0_i32_0 : i32, i32
  }
  func.func @transform_5(%arg0: i32, %arg1: i32) -> (i32, i32) {
    %c0_i32 = arith.constant 0 : i32
    %c0_i32_0 = arith.constant 0 : i32
    %c0_i32_1 = arith.constant 0 : i32
    return %c0_i32, %c0_i32_0 : i32, i32
  }
  func.func @transform_6(%arg0: i32, %arg1: i32) -> (i32, i32) {
    %c0_i32 = arith.constant 0 : i32
    %c0_i32_0 = arith.constant 0 : i32
    %c0_i32_1 = arith.constant 0 : i32
    return %c0_i32, %c0_i32_0 : i32, i32
  }
  func.func @transform_7(%arg0: i32, %arg1: i32) -> (i32, i32) {
    %c0_i32 = arith.constant 0 : i32
    %c0_i32_0 = arith.constant 0 : i32
    %c0_i32_1 = arith.constant 0 : i32
    return %c0_i32, %c0_i32_0 : i32, i32
  }
  func.func @transform_8(%arg0: i32, %arg1: i32) -> (i32, i32) {
    %c0_i32 = arith.constant 0 : i32
    %c0_i32_0 = arith.constant 0 : i32
    %c0_i32_1 = arith.constant 0 : i32
    return %c0_i32, %c0_i32_0 : i32, i32
  }
  func.func @transform_9(%arg0: i32, %arg1: i32) -> (i32, i32) {
    %c0_i32 = arith.constant 0 : i32
    %c0_i32_0 = arith.constant 0 : i32
    %c0_i32_1 = arith.constant 0 : i32
    return %c0_i32, %c0_i32_0 : i32, i32
  }
  func.func @transform_10(%arg0: i32, %arg1: i32) -> (i32, i32) {
    %c0_i32 = arith.constant 0 : i32
    %c0_i32_0 = arith.constant 0 : i32
    %c0_i32_1 = arith.constant 0 : i32
    return %c0_i32, %c0_i32_0 : i32, i32
  }
  func.func @transform_11(%arg0: i32, %arg1: i32) -> (i32, i32, i32) {
    %c0_i32 = arith.constant 0 : i32
    %c0_i32_0 = arith.constant 0 : i32
    return %arg0, %arg1, %c0_i32 : i32, i32, i32
  }
}

</mosaic_0001>

<bundles_post_ra>
// kernel: tile.43
= control target key start
LH: loop header
LB: loop body
LE: loop exit
PB: predicated region body
PF: predicated region fallthrough
CT: control target
= control target key end

     0   :  { %s28_s0 = inlined_call_operand.vmem [shape: f32[8], index: 0, kind: input, shape index: {}]   ;;  %s29_s1 = inlined_call_operand.vmem [shape: f32[16,8], index: 1, kind: output, shape index: {}]  }
   0x1   :  { %v4_v0 = vld [vmem:[%s28_s0] ss:$0 sm:$0xff] }
   0x2   :  { %5 = vst [vmem:[%s29_s1] sm:$0xff] %v4_v0  ;;  %8 = vst [vmem:[%s29_s1 + $0x8] sm:$0xff] %v4_v0 }

// kernel: tile.44
= control target key start
LH: loop header
LB: loop body
LE: loop exit
PB: predicated region body
PF: predicated region fallthrough
CT: control target
= control target key end

     0   :  { %s131_s10 = smov 120   ;;  %s132_s11 = smov 104   ;;  %vm3_vm0 = vcmask 64512   ;;  %vm9_vm1 = vcmask 1048512   ;;  %vm15_vm2 = vcmask 982912   ;;  %vm21_vm3 = vcmask 917312   ;;  %s207_s0 = inlined_call_operand.vmem [shape: f32[16,8], index: 0, kind: input, shape index: {}]   ;;  %s208_s1 = inlined_call_operand.vmem [shape: f32[1,128], index: 1, kind: output, shape index: {}]  }
   0x1   :  { %v101_v0 = vld [vmem:[%s207_s0 + $0xf] sm:$0x1]   ;;  %v103_v1 = vld [vmem:[%s207_s0 + $0xd] sm:$0x1]   ;;  %v102_v2 = vld [vmem:[%s207_s0 + $0xe] sm:$0x1]  }
   0x2   :  { %7 = vrot.lane.b32.xlu0 %v101_v0, %s131_s10  ;;  %19 = vrot.lane.b32.xlu1 %v103_v1, %s132_s11  ;;  %v104_v3 = vld [vmem:[%s207_s0 + $0xc] sm:$0x1]   ;;  %s133_s16 = smov 112   ;;  %s134_s17 = smov 96   ;;  %v105_v4 = vld [vmem:[%s207_s0 + $0xb] sm:$0x1]  }
   0x3   :  { %v106_v5 = vld [vmem:[%s207_s0 + $0xa] sm:$0x1]   ;;  %v2_v6 = vld [vmem:[%s207_s0] sm:$0x1]   ;;  %s135_s24 = smov 88   ;;  %s136_s25 = smov 80  }
   0x4   :  { %4 = vst.msk [vmem:[#allocation0] sm:$0x1] %vm3_vm0, %v2_v6   ;;  %v107_v7 = vld [vmem:[%s207_s0 + $0x9] sm:$0x1]   ;;  %v108_v8 = vld [vmem:[%s207_s0 + $0x8] sm:$0x1]  }
   0x5   :  { %s137_s30 = smov 72   ;;  %s138_s2 = smov 64   ;;  %v109_v9 = vld [vmem:[%s207_s0 + $0x7] sm:$0x1]   ;;  %v110_v10 = vld [vmem:[%s207_s0 + $0x6] sm:$0x1]  }
   0x6   :  { %13 = vrot.lane.b32.xlu0 %v102_v2, %s133_s16  ;;  %25 = vrot.lane.b32.xlu1 %v104_v3, %s134_s17  ;;  %s139_s7 = smov 56   ;;  %s140_s8 = smov 48   ;;  %v111_v11 = vld [vmem:[%s207_s0 + $0x5] sm:$0x1]   ;;  %v112_v12 = vld [vmem:[%s207_s0 + $0x4] sm:$0x1]  }
   0x7   :  { %s141_s13 = smov 40   ;;  %s142_s14 = smov 32   ;;  %v113_v13 = vld [vmem:[%s207_s0 + $0x3] sm:$0x1]   ;;  %v114_v14 = vld [vmem:[%s207_s0 + $0x2] sm:$0x1]  }
   0x8   :  { %s143_s19 = smov 24   ;;  %s144_s20 = smov 16   ;;  %v115_v15 = vld [vmem:[%s207_s0 + $0x1] sm:$0x1]   ;;  %vm27_vm4 = vcmask 851712   ;;  %vm33_vm5 = vcmask 786112  }
   0x9   :  { %s145_s0 = smov 8   ;;  %vm39_vm6 = vcmask 720512   ;;  %vm45_vm7 = vcmask 654912   ;;  %vm51_vm8 = vcmask 589312   ;;  %vm57_vm9 = vcmask 523712  }
   0xa   :  { %31 = vrot.lane.b32.xlu0 %v105_v4, %s135_s24  ;;  %37 = vrot.lane.b32.xlu1 %v106_v5, %s136_s25  ;;  %vm63_vm10 = vcmask 458112   ;;  %vm69_vm11 = vcmask 392512   ;;  %vm75_vm12 = vcmask 326912   ;;  %vm81_vm13 = vcmask 261312  }
   0xb   :  { %vm87_vm14 = vcmask 195712   ;;  %vm93_vm15 = vcmask 130112  }
   0xe   :  { %43 = vrot.lane.b32.xlu0 %v107_v7, %s137_s30  ;;  %49 = vrot.lane.b32.xlu1 %v108_v8, %s138_s2 }
  0x12   :  { %55 = vrot.lane.b32.xlu0 %v109_v9, %s139_s7  ;;  %61 = vrot.lane.b32.xlu1 %v110_v10, %s140_s8 }
  0x16   :  { %67 = vrot.lane.b32.xlu0 %v111_v11, %s141_s13  ;;  %73 = vrot.lane.b32.xlu1 %v112_v12, %s142_s14 }
  0x1a   :  { %79 = vrot.lane.b32.xlu0 %v113_v13, %s143_s19  ;;  %85 = vrot.lane.b32.xlu1 %v114_v14, %s144_s20 }
  0x1e   :  { %91 = vrot.lane.b32.xlu0 %v115_v15, %s145_s0 }
  0x74   :  { %v8_v16 = vpop.permute.xlu0 %7   ;;  %v20_v17 = vpop.permute.xlu1 %19  }
  0x75   :  { %10 = vst.msk [vmem:[#allocation0] sm:$0x1] %vm9_vm1, %v8_v16  }
  0x78   :  { %v14_v18 = vpop.permute.xlu0 %13   ;;  %v26_v19 = vpop.permute.xlu1 %25  }
  0x79   :  { %16 = vst.msk [vmem:[#allocation0] sm:$0x1] %vm15_vm2, %v14_v18  }
  0x7a   :  { %22 = vst.msk [vmem:[#allocation0] sm:$0x1] %vm21_vm3, %v20_v17  }
  0x7b   :  { %28 = vst.msk [vmem:[#allocation0] sm:$0x1] %vm27_vm4, %v26_v19  }
  0x7c   :  { %v32_v20 = vpop.permute.xlu0 %31   ;;  %v38_v21 = vpop.permute.xlu1 %37  }
  0x7d   :  { %34 = vst.msk [vmem:[#allocation0] sm:$0x1] %vm33_vm5, %v32_v20  }
  0x7e   :  { %40 = vst.msk [vmem:[#allocation0] sm:$0x1] %vm39_vm6, %v38_v21  }
  0x80   :  { %v44_v22 = vpop.permute.xlu0 %43   ;;  %v50_v23 = vpop.permute.xlu1 %49  }
  0x81   :  { %46 = vst.msk [vmem:[#allocation0] sm:$0x1] %vm45_vm7, %v44_v22  }
  0x82   :  { %52 = vst.msk [vmem:[#allocation0] sm:$0x1] %vm51_vm8, %v50_v23  }
  0x84   :  { %v56_v24 = vpop.permute.xlu0 %55   ;;  %v62_v25 = vpop.permute.xlu1 %61  }
  0x85   :  { %58 = vst.msk [vmem:[#allocation0] sm:$0x1] %vm57_vm9, %v56_v24  }
  0x86   :  { %64 = vst.msk [vmem:[#allocation0] sm:$0x1] %vm63_vm10, %v62_v25  }
  0x88   :  { %v68_v26 = vpop.permute.xlu0 %67   ;;  %v74_v27 = vpop.permute.xlu1 %73  }
  0x89   :  { %70 = vst.msk [vmem:[#allocation0] sm:$0x1] %vm69_vm11, %v68_v26  }
  0x8a   :  { %76 = vst.msk [vmem:[#allocation0] sm:$0x1] %vm75_vm12, %v74_v27  }
  0x8c   :  { %v80_v28 = vpop.permute.xlu0 %79   ;;  %v86_v29 = vpop.permute.xlu1 %85  }
  0x8d   :  { %82 = vst.msk [vmem:[#allocation0] sm:$0x1] %vm81_vm13, %v80_v28  }
  0x8e   :  { %88 = vst.msk [vmem:[#allocation0] sm:$0x1] %vm87_vm14, %v86_v29  }
  0x90   :  { %v92_v30 = vpop.permute.xlu0 %91  }
  0x91   :  { %94 = vst.msk [vmem:[#allocation0] sm:$0x1] %vm93_vm15, %v92_v30  }
  0x98   :  { %v98_v31 = vld [vmem:[#allocation0] sm:$0x1] }
  0x99   :  { %100 = vst [vmem:[%s208_s1] sm:$0x1] %v98_v31 }

// kernel: tile.58
= control target key start
LH: loop header
LB: loop body
LE: loop exit
PB: predicated region body
PF: predicated region fallthrough
CT: control target
= control target key end

     0   :  { %s22_s0 = inlined_call_operand.vmem [shape: f32[8], index: 0, kind: input, shape index: {}]   ;;  %s23_s1 = inlined_call_operand.vmem [shape: f32[8,8], index: 1, kind: output, shape index: {}]  }
   0x1   :  { %v4_v0 = vld [vmem:[%s22_s0] ss:$0 sm:$0xff] }
   0x2   :  { %5 = vst [vmem:[%s23_s1] sm:$0xff] %v4_v0 }

// kernel: tile.59
= control target key start
LH: loop header
LB: loop body
LE: loop exit
PB: predicated region body
PF: predicated region fallthrough
CT: control target
= control target key end

     0   :  { %s67_s10 = smov 56   ;;  %s68_s11 = smov 40   ;;  %vm3_vm0 = vcmask 64512   ;;  %vm9_vm1 = vcmask 523712   ;;  %vm15_vm2 = vcmask 458112   ;;  %vm21_vm3 = vcmask 392512   ;;  %s111_s0 = inlined_call_operand.vmem [shape: f32[8,8], index: 0, kind: input, shape index: {}]   ;;  %s112_s1 = inlined_call_operand.vmem [shape: f32[1,64], index: 1, kind: output, shape index: {}]  }
   0x1   :  { %v53_v0 = vld [vmem:[%s111_s0 + $0x7] sm:$0x1]   ;;  %v55_v1 = vld [vmem:[%s111_s0 + $0x5] sm:$0x1]   ;;  %v54_v2 = vld [vmem:[%s111_s0 + $0x6] sm:$0x1]  }
   0x2   :  { %7 = vrot.lane.b32.xlu0 %v53_v0, %s67_s10  ;;  %19 = vrot.lane.b32.xlu1 %v55_v1, %s68_s11  ;;  %v56_v3 = vld [vmem:[%s111_s0 + $0x4] sm:$0x1]   ;;  %v2_v4 = vld [vmem:[%s111_s0] sm:$0x1]   ;;  %s69_s18 = smov 48   ;;  %s70_s19 = smov 32  }
   0x3   :  { %4 = vst.msk [vmem:[#allocation0] sm:$0x1] %vm3_vm0, %v2_v4   ;;  %v57_v5 = vld [vmem:[%s111_s0 + $0x3] sm:$0x1]   ;;  %v58_v6 = vld [vmem:[%s111_s0 + $0x2] sm:$0x1]  }
   0x4   :  { %s71_s24 = smov 24   ;;  %s72_s25 = smov 16   ;;  %v59_v7 = vld [vmem:[%s111_s0 + $0x1] sm:$0x1]   ;;  %vm27_vm4 = vcmask 326912   ;;  %vm33_vm5 = vcmask 261312  }
   0x5   :  { %s73_s0 = smov 8   ;;  %vm39_vm6 = vcmask 195712   ;;  %vm45_vm7 = vcmask 130112  }
   0x6   :  { %13 = vrot.lane.b32.xlu0 %v54_v2, %s69_s18  ;;  %25 = vrot.lane.b32.xlu1 %v56_v3, %s70_s19 }
   0xa   :  { %31 = vrot.lane.b32.xlu0 %v57_v5, %s71_s24  ;;  %37 = vrot.lane.b32.xlu1 %v58_v6, %s72_s25 }
   0xe   :  { %43 = vrot.lane.b32.xlu0 %v59_v7, %s73_s0 }
  0x74   :  { %v8_v8 = vpop.permute.xlu0 %7   ;;  %v20_v9 = vpop.permute.xlu1 %19  }
  0x75   :  { %10 = vst.msk [vmem:[#allocation0] sm:$0x1] %vm9_vm1, %v8_v8  }
  0x78   :  { %v14_v10 = vpop.permute.xlu0 %13   ;;  %v26_v11 = vpop.permute.xlu1 %25  }
  0x79   :  { %16 = vst.msk [vmem:[#allocation0] sm:$0x1] %vm15_vm2, %v14_v10  }
  0x7a   :  { %22 = vst.msk [vmem:[#allocation0] sm:$0x1] %vm21_vm3, %v20_v9  }
  0x7b   :  { %28 = vst.msk [vmem:[#allocation0] sm:$0x1] %vm27_vm4, %v26_v11  }
  0x7c   :  { %v32_v12 = vpop.permute.xlu0 %31   ;;  %v38_v13 = vpop.permute.xlu1 %37  }
  0x7d   :  { %34 = vst.msk [vmem:[#allocation0] sm:$0x1] %vm33_vm5, %v32_v12  }
  0x7e   :  { %40 = vst.msk [vmem:[#allocation0] sm:$0x1] %vm39_vm6, %v38_v13  }
  0x80   :  { %v44_v14 = vpop.permute.xlu0 %43  }
  0x81   :  { %46 = vst.msk [vmem:[#allocation0] sm:$0x1] %vm45_vm7, %v44_v14  }
  0x88   :  { %v50_v15 = vld [vmem:[#allocation0] sm:$0x1] }
  0x89   :  { %52 = vst [vmem:[%s112_s1] sm:$0x1] %v50_v15 }

// kernel: subsample_block_forward.1
= control target key start
LH: loop header
LB: loop body
LE: loop exit
PB: predicated region body
PF: predicated region fallthrough
CT: control target
= control target key end

     0   :  { %s2345_s17 = smov 0   ;;  %s2347_s18 = smov 0   ;;  %s2811_s0 = inlined_call_operand.vmem [shape: f32[2,20,64], index: 0, kind: input, shape index: {}]   ;;  %s2812_s1 = inlined_call_operand.vmem [shape: f32[3,64,128], index: 1, kind: input, shape index: {}]   ;;  %s2813_s2 = inlined_call_operand.vmem [shape: f32[3,128,128], index: 2, kind: input, shape index: {}]   ;;  %s2814_s3 = inlined_call_operand.vmem [shape: f32[60,64], index: 3, kind: input, shape index: {}]   ;;  %s2815_s4 = inlined_call_operand.vmem [shape: f32[1,128], index: 4, kind: input, shape index: {}]   ;;  %s2816_s5 = inlined_call_operand.vmem [shape: f32[1,128], index: 5, kind: input, shape index: {}]   ;;  %s2817_s6 = inlined_call_operand.vmem [shape: f32[1,128], index: 6, kind: input, shape index: {}]   ;;  %s2818_s7 = inlined_call_operand.vmem [shape: f32[1,128], index: 7, kind: input, shape index: {}]   ;;  %s2819_s8 = inlined_call_operand.vmem [shape: f32[1,64], index: 8, kind: input, shape index: {}]   ;;  %s2820_s9 = inlined_call_operand.vmem [shape: f32[1,64], index: 9, kind: input, shape index: {}]   ;;  %s2821_s10 = inlined_call_operand.vmem [shape: f32[1,64], index: 10, kind: input, shape index: {}]   ;;  %s2822_s11 = inlined_call_operand.vmem [shape: f32[2,8,64], index: 11, kind: output, shape index: {}]  }
   0x1   :  { %s2349_s19 = smov 0  }
   0x2 LB: > { %s33_s20 = sadd.s32 1, %s2272_s18  ;;  %p1679_p0 = scmp.ge.s32.totalorder %s2276_s19, 1  ;;  %s2276_s19 = sphi %s2349_s19, %s21_s19   ;;  %s2272_s18 = sphi %s2347_s18, %s2824_s18   ;;  %s2268_s17 = sphi %s2345_s17, %s2823_s17  }
   0x3   : > { %p35_p1 = scmp.ge.s32.totalorder %s33_s20, 2  ;;  %p351_p2 = scmp.lt.s32.totalorder %s2276_s19, 3 }
   0x5   : > { %s2826_s20 = smov (%p35_p1, %s33_s20), 0  ;;  %p352_p3 = pnand %p1679_p0, %p351_p2 }
   0x6   : > { %v1685_v0 = vld [vmem:[%s2812_s1 + $0x40] sm:$0xff] (!%p352_p3)  ;;  %v1686_v1 = vld [vmem:[%s2812_s1 + $0x48] sm:$0xff] (!%p352_p3)  ;;  %v2278_v3 = vmov (!%p352_p3), 0.0|0.0   ;;  %v1687_v6 = vld [vmem:[%s2812_s1 + $0x50] sm:$0xff] (!%p352_p3)  ;;  %p393_p4 = scmp.lt.s32.totalorder (!%p352_p3), %s2268_s17, 1  ;;  %vm2279_vm0 = vmmov (!%p352_p3), 0  }
   0x7   : > { %355 = sbr.rel (%p352_p3) target bundleno = 663 (0x297), region = 64  ;;  %v410_v2 = vld [vmem:[%s2812_s1] sm:$0xff] (!%p352_p3)  ;;  %2071 = vmatprep.subr.bf16.mxu0 (!%p352_p3), %v2278_v3  ;;  %v2072_v4 = vpack.c.bf16 (!%p352_p3), %v1686_v1, %v1685_v0  ;;  %2083 = vmatprep.subr.bf16.mxu1 (!%p352_p3), %v2278_v3  ;;  %v411_v5 = vld [vmem:[%s2812_s1 + $0x8] sm:$0xff] (!%p352_p3)  ;;  %v1688_v7 = vld [vmem:[%s2812_s1 + $0x58] sm:$0xff] (!%p352_p3)  ;;  %v2280_v11 = vmov (!%p352_p3), 0.0   ;;  %vm432_vm1 = vcmask (!%p352_p3), 523264  }
   0x8   : > { %v2084_v8 = vpack.c.bf16 (!%p352_p3), %v411_v5, %v410_v2  ;;  %v412_v9 = vld [vmem:[%s2812_s1 + $0x10] sm:$0xff] (!%p352_p3)  ;;  %v413_v10 = vld [vmem:[%s2812_s1 + $0x18] sm:$0xff] (!%p352_p3)  ;;  %1888 = vmatprep.mubr.msk.f32.mxu0 (!%p352_p3), %vm2279_vm0, %v2280_v11  ;;  %1913 = vmatprep.mubr.msk.f32.mxu1 (!%p352_p3), %vm2279_vm0, %v2280_v11  ;;  %v2075_v12 = vpack.c.bf16 (!%p352_p3), %v1688_v7, %v1687_v6  ;;  %v1689_v14 = vld [vmem:[%s2812_s1 + $0x60] sm:$0xff] (!%p352_p3)  ;;  %vm1472_vm4 = vcmask (!%p352_p3), 1043456   ;;  %vm2283_vm5 = vmmov (!%p352_p3), 1   ;;  %s2284_s30 = smov (!%p352_p3), 64  }
   0x9   : > { %2073 = vmatpush3.bf16.msra.mxu0 (!%p352_p3), %v2072_v4  ;;  %v2087_v13 = vpack.c.bf16 (!%p352_p3), %v413_v10, %v412_v9  ;;  %v1690_v15 = vld [vmem:[%s2812_s1 + $0x68] sm:$0xff] (!%p352_p3)  ;;  %v414_v16 = vld [vmem:[%s2812_s1 + $0x20] sm:$0xff] (!%p352_p3)  ;;  %v1691_v20 = vld [vmem:[%s2812_s1 + $0x70] sm:$0xff] (!%p352_p3)  ;;  %vm1455_vm7 = vcmask (!%p352_p3), 1041409   ;;  %vm1457_vm8 = vcmask (!%p352_p3), 1042434   ;;  %vm1459_vm9 = vcmask (!%p352_p3), 1043459  }
   0xa   : > { %2085 = vmatpush3.bf16.msra.mxu1 (!%p352_p3), %v2084_v8  ;;  %2074 = vmatprep.subr.bf16.mxu0 (!%p352_p3), %v2278_v3  ;;  %v415_v17 = vld [vmem:[%s2812_s1 + $0x28] sm:$0xff] (!%p352_p3)  ;;  %v2078_v18 = vpack.c.bf16 (!%p352_p3), %v1690_v15, %v1689_v14  ;;  %v1692_v21 = vld [vmem:[%s2812_s1 + $0x78] sm:$0xff] (!%p352_p3)  ;;  %v416_v22 = vld [vmem:[%s2812_s1 + $0x30] sm:$0xff] (!%p352_p3)  ;;  %vm1461_vm10 = vcmask (!%p352_p3), 1044484   ;;  %vm1463_vm11 = vcmask (!%p352_p3), 1045509   ;;  %vm1465_vm12 = vcmask (!%p352_p3), 1046534  }
   0xb   : > { %2086 = vmatprep.subr.bf16.mxu1 (!%p352_p3), %v2278_v3  ;;  %v2090_v19 = vpack.c.bf16 (!%p352_p3), %v415_v17, %v414_v16  ;;  %v417_v23 = vld [vmem:[%s2812_s1 + $0x38] sm:$0xff] (!%p352_p3)  ;;  %v2081_v24 = vpack.c.bf16 (!%p352_p3), %v1692_v21, %v1691_v20  ;;  %v1702_v26 = vld [vmem:[%s2812_s1 + $0x80] sm:$0xff] (!%p352_p3)  ;;  %v1703_v27 = vld [vmem:[%s2812_s1 + $0x88] sm:$0xff] (!%p352_p3)  ;;  %vm1467_vm13 = vcmask (!%p352_p3), 1047559   ;;  %vm1469_vm14 = vcmask (!%p352_p3), 490496  }
   0xc   : > { %v2093_v25 = vpack.c.bf16 (!%p352_p3), %v417_v23, %v416_v22  ;;  %v2096_v29 = vpack.c.bf16 (!%p352_p3), %v1703_v27, %v1702_v26  ;;  %v1704_v31 = vld [vmem:[%s2812_s1 + $0x90] sm:$0xff] (!%p352_p3)  ;;  %v1705_v32 = vld [vmem:[%s2812_s1 + $0x98] sm:$0xff] (!%p352_p3)  ;;  %v1706_v36 = vld [vmem:[%s2812_s1 + $0xa0] sm:$0xff] (!%p352_p3) }
   0xd   : > { %2076 = vmatpush3.bf16.msra.mxu0 (!%p352_p3), %v2075_v12  ;;  %v2099_v33 = vpack.c.bf16 (!%p352_p3), %v1705_v32, %v1704_v31  ;;  %v1707_v37 = vld [vmem:[%s2812_s1 + $0xa8] sm:$0xff] (!%p352_p3)  ;;  %v1708_v41 = vld [vmem:[%s2812_s1 + $0xb0] sm:$0xff] (!%p352_p3)  ;;  %v1709_v42 = vld [vmem:[%s2812_s1 + $0xb8] sm:$0xff] (!%p352_p3) }
   0xe   : > { %s2828_s17 = smov (!%p393_p4, %s2268_s17), 1  ;;  %2088 = vmatpush3.bf16.msra.mxu1 %v2087_v13  ;;  %2077 = vmatprep.subr.bf16.mxu0 %v2278_v3  ;;  %v2102_v38 = vpack.c.bf16 %v1707_v37, %v1706_v36  ;;  %v2105_v43 = vpack.c.bf16 %v1709_v42, %v1708_v41  ;;  %v782_v47 = vld [vmem:[%s2813_s2] sm:$0xff]  ;;  %v783_v48 = vld [vmem:[%s2813_s2 + $0x8] sm:$0xff]  ;;  %v784_v50 = vld [vmem:[%s2813_s2 + $0x10] sm:$0xff]  ;;  %v2281_v36 = vmov 1983009808  }
   0xf   : > { %s2220_s15 = smul.u32 24, %s2828_s17  ;;  %2089 = vmatprep.subr.bf16.mxu1 %v2278_v3  ;;  %v2139_v49 = vpack.c.bf16 %v783_v48, %v782_v47  ;;  %v785_v51 = vld [vmem:[%s2813_s2 + $0x18] sm:$0xff]  ;;  %v786_v53 = vld [vmem:[%s2813_s2 + $0x20] sm:$0xff]  ;;  %v787_v54 = vld [vmem:[%s2813_s2 + $0x28] sm:$0xff]  ;;  %v1076_v37 = vunpack.c.l.s4 %v2281_v36 }
  0x10   : > { %v2143_v52 = vpack.c.bf16 %v785_v51, %v784_v50  ;;  %v2147_v55 = vpack.c.bf16 %v787_v54, %v786_v53  ;;  %v788_v56 = vld [vmem:[%s2813_s2 + $0x30] sm:$0xff]  ;;  %v789_v57 = vld [vmem:[%s2813_s2 + $0x38] sm:$0xff]  ;;  %v1718_v59 = vld [vmem:[%s2813_s2 + $0x80] sm:$0xff] }
  0x11   : > { %2079 = vmatpush3.bf16.msra.mxu0 %v2078_v18  ;;  %s2434_s26 = scalar_lea.vmem %s2811_s0, %s2220_s15  ;;  %v2151_v58 = vpack.c.bf16 %v789_v57, %v788_v56  ;;  %v1719_v60 = vld [vmem:[%s2813_s2 + $0x88] sm:$0xff]  ;;  %v790_v62 = vld [vmem:[%s2813_s2 + $0x40] sm:$0xff]  ;;  %v1720_v1 = vld [vmem:[%s2813_s2 + $0x90] sm:$0xff] }
  0x12   : > { %2091 = vmatpush3.bf16.msra.mxu1 %v2090_v19  ;;  %2080 = vmatprep.subr.bf16.mxu0 %v2278_v3  ;;  %v1682_v28 = vld [vmem:[%s2434_s26 + $0x1] sm:$0xff]  ;;  %v1683_v34 = vld [vmem:[%s2434_s26 + $0x9] sm:$0xff]  ;;  %v1684_v39 = vld [vmem:[%s2434_s26 + $0x11] sm:$0x3]  ;;  %v2107_v61 = vpack.c.bf16 %v1719_v60, %v1718_v59 }
  0x13   : > { %2092 = vmatprep.subr.bf16.mxu1 %v2278_v3  ;;  %v407_v30 = vld [vmem:[%s2434_s26] sm:$0xff]  ;;  %v408_v35 = vld [vmem:[%s2434_s26 + $0x8] sm:$0xff]  ;;  %v409_v40 = vld [vmem:[%s2434_s26 + $0x10] sm:$0x3] }
  0x14   : > { %v2488_v44 = vld [vmem:[%s2434_s26 + $0x2] sm:$0xff]  ;;  %v2495_v45 = vld [vmem:[%s2434_s26 + $0xa] sm:$0xff]  ;;  %v1701_v46 = vld [vmem:[%s2434_s26 + $0x12] sm:$0x3]  ;;  %s2282_s26 = smov 124  }
  0x15   : > { %2082 = vmatpush3.bf16.msra.mxu0 %v2081_v24  ;;  %v791_v63 = vld [vmem:[%s2813_s2 + $0x48] sm:$0xff]  ;;  %v1721_v2 = vld [vmem:[%s2813_s2 + $0x98] sm:$0xff]  ;;  %v792_v5 = vld [vmem:[%s2813_s2 + $0x50] sm:$0xff]  ;;  %v1303_v47 = vcombine.high %v2495_v45, %v2495_v45 }
  0x16   : > { %2094 = vmatpush3.bf16.msra.mxu1 %v2093_v25  ;;  %2095 = vmatprep.subr.bf16.mxu0 %v2278_v3  ;;  %v2155_v0 = vpack.c.bf16 %v791_v63, %v790_v62  ;;  %v2111_v4 = vpack.c.bf16 %v1721_v2, %v1720_v1  ;;  %v793_v6 = vld [vmem:[%s2813_s2 + $0x58] sm:$0xff]  ;;  %v1722_v8 = vld [vmem:[%s2813_s2 + $0xa0] sm:$0xff]  ;;  %v1723_v9 = vld [vmem:[%s2813_s2 + $0xa8] sm:$0xff] }
  0x17   : > { %2140 = vmatprep.subr.bf16.mxu1 %v2139_v49  ;;  %v2159_v7 = vpack.c.bf16 %v793_v6, %v792_v5  ;;  %v2115_v10 = vpack.c.bf16 %v1723_v9, %v1722_v8  ;;  %v794_v12 = vld [vmem:[%s2813_s2 + $0x60] sm:$0xff]  ;;  %v795_v13 = vld [vmem:[%s2813_s2 + $0x68] sm:$0xff]  ;;  %v1724_v15 = vld [vmem:[%s2813_s2 + $0xb0] sm:$0xff] }
  0x18   : > { %1889 = vmatmul.mubr.msk.f32.vlgmr.msra.gmra.mrb[0].mxu0 %vm432_vm1, %v1682_v28  ;;  %v2163_v14 = vpack.c.bf16 %v795_v13, %v794_v12  ;;  %v1725_v16 = vld [vmem:[%s2813_s2 + $0xb8] sm:$0xff]  ;;  %v796_v18 = vld [vmem:[%s2813_s2 + $0x70] sm:$0xff]  ;;  %v1726_v21 = vld [vmem:[%s2813_s2 + $0xc0] sm:$0xff] }
  0x19   : > { %1914 = vmatmul.mubr.msk.f32.vlgmr.msra.gmra.mrb[0].mxu1 %vm432_vm1, %v407_v30  ;;  %2097 = vmatpush3.bf16.msra.mxu0 %v2096_v29  ;;  %v2119_v17 = vpack.c.bf16 %v1725_v16, %v1724_v15  ;;  %v797_v19 = vld [vmem:[%s2813_s2 + $0x78] sm:$0xff]  ;;  %v1727_v22 = vld [vmem:[%s2813_s2 + $0xc8] sm:$0xff]  ;;  %v1734_v24 = vld [vmem:[%s2813_s2 + $0x100] sm:$0xff] }
  0x1a   : > { %2098 = vmatprep.subr.bf16.mxu0 %v2278_v3  ;;  %1891 = vmatprep.mubr.msk.f32.mxu0 %vm2279_vm0, %v2280_v11  ;;  %v2167_v20 = vpack.c.bf16 %v797_v19, %v796_v18  ;;  %v2123_v23 = vpack.c.bf16 %v1727_v22, %v1726_v21  ;;  %v1735_v25 = vld [vmem:[%s2813_s2 + $0x108] sm:$0xff]  ;;  %v1728_v27 = vld [vmem:[%s2813_s2 + $0xd0] sm:$0xff]  ;;  %v1729_v28 = vld [vmem:[%s2813_s2 + $0xd8] sm:$0xff] }
  0x1b   : > { %1916 = vmatprep.mubr.msk.f32.mxu1 %vm2279_vm0, %v2280_v11  ;;  %2142 = vmatpush3.bf16.msra.mxu1 %v2139_v49  ;;  %v2587_v26 = vpack.c.bf16 %v1735_v25, %v1734_v24  ;;  %v2127_v29 = vpack.c.bf16 %v1729_v28, %v1728_v27  ;;  %v1730_v30 = vld [vmem:[%s2813_s2 + $0xe0] sm:$0xff]  ;;  %v1731_v31 = vld [vmem:[%s2813_s2 + $0xe8] sm:$0xff]  ;;  %vm2214_vm6 = vmpackc.low %vm1472_vm4, %vm2283_vm5 }
  0x1c   : > { %1892 = vmatmul.mubr.msk.f32.gmra.mrb[2].mxu0 %vm432_vm1, %v1683_v34  ;;  %2144 = vmatprep.subr.bf16.mxu1 %v2143_v52  ;;  %v2131_v32 = vpack.c.bf16 %v1731_v31, %v1730_v30  ;;  %v1733_v34 = vld [vmem:[%s2813_s2 + $0xf8] sm:$0xff]  ;;  %v1713_v22 = vld [vmem:[%s2815_s4] ss:$0 sm:$0xff] }
  0x1d   : > { %2100 = vmatpush3.bf16.msra.mxu0 %v2099_v33  ;;  %1917 = vmatmul.mubr.msk.f32.gmra.mrb[2].mxu1 %vm432_vm1, %v408_v35  ;;  %v1732_v33 = vld [vmem:[%s2813_s2 + $0xf0] sm:$0xff]  ;;  %v1714_v28 = vld [vmem:[%s2816_s5] ss:$0 sm:$0xff] }
  0x1e   : > { %2101 = vmatprep.subr.bf16.mxu0 %v2278_v3  ;;  %1894 = vmatprep.mubr.msk.f32.mxu0 %vm2279_vm0, %v2280_v11  ;;  %v2135_v35 = vpack.c.bf16 %v1733_v34, %v1732_v33  ;;  %v1715_v34 = vld [vmem:[%s2817_s6] ss:$0 sm:$0xff] }
  0x1f   : > { %1919 = vmatprep.mubr.msk.f32.mxu1 %vm2279_vm0, %v2280_v11  ;;  %2146 = vmatpush3.bf16.msra.mxu1 %v2143_v52 }
  0x20   : > { %1895 = vmatmul.mubr.msk.f32.gmra.mrb[4].mxu0 %vm432_vm1, %v1684_v39  ;;  %2148 = vmatprep.subr.bf16.mxu1 %v2147_v55  ;;  %v1077_v39 = vunpack.c.0.s8 %v1076_v37 }
  0x21   : > { %2103 = vmatpush3.bf16.msra.mxu0 %v2102_v38  ;;  %1920 = vmatmul.mubr.msk.f32.gmra.mrb[4].mxu1 %vm432_vm1, %v409_v40  ;;  %v750_v38 = vlaneseq }
  0x22   : > { %2104 = vmatprep.subr.bf16.mxu0 %v2278_v3  ;;  %1938 = vmatprep.mubr.msk.f32.mxu0 %vm2279_vm0, %v2280_v11 }
  0x23   : > { %2150 = vmatpush3.bf16.msra.mxu1 %v2147_v55  ;;  %v2609_v40 = vshrl.u32 %v750_v38, 7 }
  0x24   : > { %2152 = vmatprep.subr.bf16.mxu1 %v2151_v58 }
  0x25   : > { %2106 = vmatpush3.bf16.msra.mxu0 %v2105_v43  ;;  %v2612_v41 = vsub.s32 %v1077_v39, %v2609_v40  ;;  %v1286_v43 = vcombine.high %v2488_v44, %v2488_v44  ;;  %v756_v24 = vadd.s32 4294967295, %v2609_v40  ;;  %v753_v33 = vadd.s32 16, %v2609_v40 }
  0x26   : > { %2108 = vmatprep.subr.bf16.mxu0 %v2107_v61 }
  0x27   : > { %2154 = vmatpush3.bf16.msra.mxu1 %v2151_v58  ;;  %v1293_v42 = vrot.slane %v2488_v44, %v2612_v41  ;;  %v1300_v49 = vrot.slane %v1286_v43, %v2612_v41  ;;  %v1317_v52 = vrot.slane %v1303_v47, %v2612_v41  ;;  %vm759_vm2 = vcmp.ge.s32.totalorder %v756_v24, 0  ;;  %v1747_v24 = vld [vmem:[%s2813_s2 + $0x168] sm:$0xff] }
  0x28   : > { %1939 = vmatmul.mubr.msk.f32.vlgmr.msra.gmra.mrb[6].mxu0 %vm432_vm1, %v2488_v44  ;;  %2156 = vmatprep.subr.bf16.mxu1 %v2155_v0  ;;  %v1716_v37 = vsel %vm759_vm2, 1.0, %v2280_v11 }
  0x29   : > { %1941 = vmatprep.mubr.msk.f32.mxu0 %vm2279_vm0, %v2280_v11  ;;  %2110 = vmatpush3.bf16.msra.mxu0 %v2107_v61  ;;  %v1763_v48 = vrot.slane %v1293_v42, 9  ;;  %v1301_v50 = vcombine.high %v1293_v42, %v1293_v42  ;;  %v1765_v54 = vrot.slane %v1300_v49, 9  ;;  %v1302_v57 = vcombine.high %v1300_v49, %v1300_v49 }
  0x2a   : > { %2112 = vmatprep.subr.bf16.mxu0 %v2111_v4  ;;  %v1319_v61 = vcombine.high %v1317_v52, %v1317_v52  ;;  %v1769_v63 = vrot.slane %v1317_v52, 9 }
  0x2b   : > { %2158 = vmatpush3.bf16.msra.mxu1 %v2155_v0  ;;  %v2624_v53 = vmax.f32 %v1293_v42, %v1763_v48  ;;  %v1764_v55 = vrot.slane %v1301_v50, 9  ;;  %v2627_v44 = vmax.f32 %v1300_v49, %v1765_v54  ;;  %v1766_v60 = vrot.slane %v1302_v57, 9  ;;  %v1736_v48 = vld [vmem:[%s2813_s2 + $0x110] sm:$0xff]  ;;  %v1737_v49 = vld [vmem:[%s2813_s2 + $0x118] sm:$0xff] }
  0x2c   : > { %1942 = vmatmul.mubr.msk.f32.gmra.mrb[8].mxu0 %vm432_vm1, %v2495_v45  ;;  %2160 = vmatprep.subr.bf16.mxu1 %v2159_v7  ;;  %v1770_v1 = vrot.slane %v1319_v61, 9  ;;  %v2641_v2 = vmax.f32 %v1317_v52, %v1769_v63 }
  0x2d   : > { %1944 = vmatprep.mubr.msk.f32.mxu0 %vm2279_vm0, %v2280_v11  ;;  %2114 = vmatpush3.bf16.msra.mxu0 %v2111_v4  ;;  %v2629_v58 = vmax.f32 %v1301_v50, %v1764_v55  ;;  %v2638_v0 = vmax.f32 %v1302_v57, %v1766_v60  ;;  %v1738_v57 = vld [vmem:[%s2813_s2 + $0x120] sm:$0xff] }
  0x2e   : > { %2116 = vmatprep.subr.bf16.mxu0 %v2115_v10  ;;  %1368 = vrot.lane.b32.xlu0 %v2624_v53, %s2282_s26  ;;  %v2644_v4 = vmax.f32 %v1319_v61, %v1770_v1 }
  0x2f   : > { %2162 = vmatpush3.bf16.msra.mxu1 %v2159_v7  ;;  %1372 = vrot.lane.b32.xlu1 %v2627_v44, %s2282_s26 }
  0x30   : > { %1945 = vmatmul.mubr.msk.f32.gmra.mrb[10].mxu0 %vm432_vm1, %v1701_v46  ;;  %2164 = vmatprep.subr.bf16.mxu1 %v2163_v14  ;;  %v1310_v46 = vrot.slane %v2495_v45, %v2612_v41 }
  0x31   : > { %2118 = vmatpush3.bf16.msra.mxu0 %v2115_v10 }
  0x32   : > { %2120 = vmatprep.subr.bf16.mxu0 %v2119_v17  ;;  %v1318_v51 = vcombine.high %v1310_v46, %v1310_v46  ;;  %v1767_v45 = vrot.slane %v1310_v46, 9  ;;  %1370 = vrot.lane.b32.xlu0 %v2629_v58, %s2282_s26 }
  0x33   : > { %2166 = vmatpush3.bf16.msra.mxu1 %v2163_v14 }
  0x34   : > { %2168 = vmatprep.subr.bf16.mxu1 %v2167_v20  ;;  %v1768_v56 = vrot.slane %v1318_v51, 9  ;;  %v2635_v62 = vmax.f32 %v1310_v46, %v1767_v45  ;;  %v758_v46 = vadd.s32 4294967295, %v753_v33  ;;  %v1739_v45 = vld [vmem:[%s2813_s2 + $0x128] sm:$0xff]  ;;  %v1407_v33 = vld [vmem:[%s2814_s3 + $0x38] sm:$0xf] }
  0x35   : > { %2122 = vmatpush3.bf16.msra.mxu0 %v2119_v17  ;;  %v2179_v1 = vpack.c.bf16 %v1739_v45, %v1738_v57 }
  0x36   : > { %2124 = vmatprep.subr.bf16.mxu0 %v2123_v23  ;;  %v2632_v59 = vmax.f32 %v1318_v51, %v1768_v56  ;;  %1376 = vrot.lane.b32.xlu0 %v2635_v62, %s2282_s26  ;;  %vm764_vm3 = vcmp.lt.s32.totalorder %v758_v46, 16  ;;  %v2175_v56 = vpack.c.bf16 %v1737_v49, %v1736_v48 }
  0x37   : > { %2170 = vmatpush3.bf16.msra.mxu1 %v2167_v20  ;;  %v1717_v61 = vsel %vm764_vm3, 1.0, %v2280_v11 }
  0x38   : > { %2172 = vmatprep.subr.bf16.mxu1 %v2587_v26  ;;  %1378 = vrot.lane.b32.xlu1 %v2632_v59, %s2282_s26 }
  0x39   : > { %2126 = vmatpush3.bf16.msra.mxu0 %v2123_v23 }
  0x3a   : > { %2128 = vmatprep.subr.bf16.mxu0 %v2127_v29  ;;  %1380 = vrot.lane.b32.xlu0 %v2641_v2, %s2282_s26 }
  0x3c   : > { %1374 = vrot.lane.b32.xlu1 %v2638_v0, %s2282_s26 }
  0x3d   : > { %2130 = vmatpush3.bf16.msra.mxu0 %v2127_v29 }
  0x3e   : > { %2132 = vmatprep.subr.bf16.mxu0 %v2131_v32 }
  0x40   : > { %1382 = vrot.lane.b32.xlu1 %v2644_v4, %s2282_s26  ;;  %s1681_s26 = sshll.u32 %s2828_s17, 3 }
  0x41   : > { %2134 = vmatpush3.bf16.msra.mxu0 %v2131_v32  ;;  %s404_s24 = scalar_lea.vmem %s2822_s11, %s1681_s26 }
  0x42   : > { %2136 = vmatprep.subr.bf16.mxu0 %v2135_v35 }
  0x45   : > { %2138 = vmatpush3.bf16.msra.mxu0 %v2135_v35 }
  0x46   : > { %2203 = vmatprep.subr.bf16.mxu0 %v2278_v3 }
  0xeb   : > { %v508_v5 = vpop.f32.mrb[0].mxu0 }
  0xec   : > { %v1890_v6 = vpop.f32.mrb[1].mxu0  ;;  %v597_v7 = vpop.f32.mrb[0].mxu1 }
  0xed   : > { %v598_v8 = vadd.f32 %v597_v7, %v508_v5  ;;  %v1915_v9 = vpop.f32.mrb[1].mxu1  ;;  %v1740_v5 = vld [vmem:[%s2813_s2 + $0x130] sm:$0xff]  ;;  %v1741_v6 = vld [vmem:[%s2813_s2 + $0x138] sm:$0xff] }
  0xef   : > { %v513_v10 = vpop.f32.mrb[2].mxu0 }
  0xf0   : > { %v1893_v12 = vpop.f32.mrb[3].mxu0  ;;  %v602_v13 = vpop.f32.mrb[2].mxu1 }
  0xf1   : > { %v603_v14 = vadd.f32 %v602_v13, %v513_v10  ;;  %v1918_v15 = vpop.f32.mrb[3].mxu1  ;;  %v1743_v12 = vld [vmem:[%s2813_s2 + $0x148] sm:$0xff]  ;;  %v1400_v13 = vld [vmem:[%s2814_s3] sm:$0xff] }
  0xf3   : > { %v518_v16 = vpop.f32.mrb[4].mxu0 }
  0xf4   : > { %v1896_v17 = vpop.f32.mrb[5].mxu0  ;;  %v607_v18 = vpop.f32.mrb[4].mxu1 }
  0xf5   : > { %v608_v19 = vadd.f32 %v607_v18, %v518_v16  ;;  %v1921_v20 = vpop.f32.mrb[5].mxu1  ;;  %v1744_v16 = vld [vmem:[%s2813_s2 + $0x150] sm:$0xff]  ;;  %v1745_v17 = vld [vmem:[%s2813_s2 + $0x158] sm:$0xff] }
  0xf6   : > { %v1403_v20 = vld [vmem:[%s2814_s3 + $0x18] sm:$0xff] }
  0xfb   : > { %v700_v21 = vpop.f32.mrb[6].mxu0 }
  0xfc   : > { %v714_v23 = vadd.f32 %v700_v21, %v598_v8  ;;  %v1940_v25 = vpop.f32.mrb[7].mxu0  ;;  %v2183_v8 = vpack.c.bf16 %v1741_v6, %v1740_v5 }
  0xfe   : > { %v724_v27 = vadd.f32 %v1713_v22, %v714_v23  ;;  %v1746_v23 = vld [vmem:[%s2813_s2 + $0x160] sm:$0xff] }
  0xff   : > { %v705_v29 = vpop.f32.mrb[8].mxu0 }
 0x100   : > { %v727_v30 = vmax.f32 %v724_v27, 0.0  ;;  %v715_v31 = vadd.f32 %v705_v29, %v603_v14  ;;  %v1943_v32 = vpop.f32.mrb[9].mxu0  ;;  %v1401_v14 = vld [vmem:[%s2814_s3 + $0x8] sm:$0xff]  ;;  %v1404_v27 = vld [vmem:[%s2814_s3 + $0x20] sm:$0xff]  ;;  %v2195_v29 = vpack.c.bf16 %v1747_v24, %v1746_v23 }
 0x101   : > { %v2204_v18 = vpack.c.bf16 %v1401_v14, %v1400_v13  ;;  %v1406_v32 = vld [vmem:[%s2814_s3 + $0x30] sm:$0xff] }
 0x102   : > { %v737_v35 = vmul.f32 %v1714_v28, %v727_v30  ;;  %v725_v36 = vadd.f32 %v1713_v22, %v715_v31  ;;  %v1748_v30 = vld [vmem:[%s2813_s2 + $0x170] sm:$0xff] }
 0x103   : > { %v710_v38 = vpop.f32.mrb[10].mxu0 }
 0x104   : > { %v747_v39 = vadd.f32 %v1715_v34, %v737_v35  ;;  %v728_v42 = vmax.f32 %v725_v36, 0.0  ;;  %v716_v43 = vadd.f32 %v710_v38, %v608_v19  ;;  %v1946_v47 = vpop.f32.mrb[11].mxu0  ;;  %v1402_v19 = vld [vmem:[%s2814_s3 + $0x10] sm:$0xff]  ;;  %v2213_v35 = vpack.c.bf16 %v1407_v33, %v1406_v32  ;;  %v1369_v36 = vpop.permute.xlu0 %1368 }
 0x105   : > { %v2207_v25 = vpack.c.bf16 %v1403_v20, %v1402_v19  ;;  %v1392_v38 = vmax.f32 %v2624_v53, %v1369_v36 }
 0x106   : > { %v774_v50 = vmul.f32 %v1716_v37, %v747_v39  ;;  %v738_v51 = vmul.f32 %v1714_v28, %v728_v42  ;;  %v726_v52 = vadd.f32 %v1713_v22, %v716_v43  ;;  %v2191_v22 = vpack.c.bf16 %v1745_v17, %v1744_v16  ;;  %v1373_v39 = vpop.permute.xlu1 %1372 }
 0x107   : > { %v2734_v37 = vsub.s32 0, %v2609_v40  ;;  %v1394_v42 = vmax.f32 %v2627_v44, %v1373_v39 }
 0x108   : > { %777 = vst [vmem:[#allocation2] sm:$0xff] %v774_v50  ;;  %v748_v54 = vadd.f32 %v1715_v34, %v738_v51  ;;  %v729_v55 = vmax.f32 %v726_v52, 0.0  ;;  %2014 = vmatprep.mubr.f32.mxu1 %v774_v50  ;;  %v1371_v43 = vpop.permute.xlu0 %1370 }
 0x109   : > { %v1426_v46 = vrot.slane %v1392_v38, %v2734_v37  ;;  %v1393_v47 = vmax.f32 %v2629_v58, %v1371_v43  ;;  %v1434_v49 = vrot.slane %v1394_v42, %v2734_v37 }
 0x10a   : > { %778 = vst [vmem:[#allocation2 + $0x8] sm:$0xff] %v748_v54  ;;  %v739_v60 = vmul.f32 %v1714_v28, %v729_v55  ;;  %2015 = vmatmul.mubr.f32.vlgmr.msra.gmra.mrb[6].mxu1 %v748_v54  ;;  %v1405_v28 = vld [vmem:[%s2814_s3 + $0x28] sm:$0xff] }
 0x10b   : > { %2174 = vmatpush3.bf16.msra.mxu1 %v2587_v26  ;;  %v1742_v26 = vld [vmem:[%s2813_s2 + $0x140] sm:$0xff]  ;;  %v2210_v31 = vpack.c.bf16 %v1405_v28, %v1404_v27  ;;  %v1430_v40 = vrot.slane %v1393_v47, %v2734_v37 }
 0x10c   : > { %v749_v63 = vadd.f32 %v1715_v34, %v739_v60  ;;  %2176 = vmatprep.subr.bf16.mxu1 %v2175_v56  ;;  %v2187_v15 = vpack.c.bf16 %v1743_v12, %v1742_v26  ;;  %v1377_v53 = vpop.permute.xlu0 %1376 }
 0x10d   : > { %v1456_v50 = vsel %vm1455_vm7, %v1430_v40, %v1426_v46  ;;  %v1396_v44 = vmax.f32 %v2635_v62, %v1377_v53 }
 0x10e   : > { %v776_v7 = vmul.f32 %v1717_v61, %v749_v63  ;;  %v1458_v55 = vsel %vm1457_vm8, %v1434_v49, %v1456_v50 }
 0x10f   : > { %2178 = vmatpush3.bf16.msra.mxu1 %v2175_v56  ;;  %v1442_v58 = vrot.slane %v1396_v44, %v2734_v37 }
 0x110   : > { %779 = vst [vmem:[#allocation2 + $0x10] sm:$0x3] %v776_v7  ;;  %2180 = vmatprep.subr.bf16.mxu1 %v2179_v1  ;;  %v1381_v56 = vpop.permute.xlu0 %1380 }
 0x111   : > { %v798_v9 = vld [vmem:[#allocation2 + $0x1] sm:$0xff]  ;;  %v1398_v60 = vmax.f32 %v2641_v2, %v1381_v56 }
 0x112   : > { %v967_v10 = vld [vmem:[#allocation2 + $0x2] sm:$0xff]  ;;  %1979 = vmatprep.mubr.f32.mxu0 %v798_v9 }
 0x113   : > { %2049 = vmatprep.mubr.f32.mxu1 %v967_v10  ;;  %2182 = vmatpush3.bf16.msra.mxu1 %v2179_v1 }
 0x114   : > { %2184 = vmatprep.subr.bf16.mxu1 %v2183_v8 }
 0x117   : > { %v799_v21 = vld [vmem:[#allocation2 + $0x9] sm:$0xff]  ;;  %2186 = vmatpush3.bf16.msra.mxu1 %v2183_v8 }
 0x118   : > { %1980 = vmatmul.mubr.f32.vlgmr.msra.gmra.mrb[12].mxu0 %v799_v21  ;;  %2188 = vmatprep.subr.bf16.mxu1 %v2187_v15  ;;  %v968_v48 = vld [vmem:[#allocation2 + $0xa] sm:$0xff] }
 0x119   : > { %2205 = vmatpush3.bf16.msra.mxu0 %v2204_v18  ;;  %2068 = vmatprep.mubr.msk.f32.mxu0 %vm2279_vm0, %v2280_v11  ;;  %v1749_v11 = vld [vmem:[%s2813_s2 + $0x178] sm:$0xff] }
 0x11a   : > { %2206 = vmatprep.subr.bf16.mxu0 %v2278_v3  ;;  %v2199_v34 = vpack.c.bf16 %v1749_v11, %v1748_v30 }
 0x11b   : > { %2190 = vmatpush3.bf16.msra.mxu1 %v2187_v15 }
 0x11c   : > { %2192 = vmatprep.subr.bf16.mxu1 %v2191_v22 }
 0x11d   : > { %2208 = vmatpush3.bf16.msra.mxu0 %v2207_v25 }
 0x11e   : > { %2209 = vmatprep.subr.bf16.mxu0 %v2278_v3 }
 0x11f   : > { %2194 = vmatpush3.bf16.msra.mxu1 %v2191_v22 }
 0x120   : > { %2196 = vmatprep.subr.bf16.mxu1 %v2195_v29 }
 0x121   : > { %2211 = vmatpush3.bf16.msra.mxu0 %v2210_v31 }
 0x122   : > { %2212 = vmatprep.subr.bf16.mxu0 %v2278_v3  ;;  %v1379_v3 = vpop.permute.xlu1 %1378 }
 0x123   : > { %2198 = vmatpush3.bf16.msra.mxu1 %v2195_v29  ;;  %v1397_v51 = vmax.f32 %v2632_v59, %v1379_v3  ;;  %v1759_v3 = vld [vmem:[%s2819_s8] ss:$0 sm:$0xff] }
 0x124   : > { %2200 = vmatprep.subr.bf16.mxu1 %v2199_v34  ;;  %v1202_v40 = vcombine.high %v1759_v3, %v1759_v3 }
 0x125   : > { %2215 = vmatpush3.bf16.msk.msra.mxu0 %vm2214_vm6, %v2213_v35  ;;  %v1446_v57 = vrot.slane %v1397_v51, %v2734_v37  ;;  %v1209_v51 = vrot.slane %v1759_v3, %v2612_v41 }
 0x126   : > { %v1375_v52 = vpop.permute.xlu1 %1374  ;;  %v1216_v44 = vrot.slane %v1202_v40, %v2612_v41 }
 0x127   : > { %2202 = vmatpush3.bf16.msra.mxu1 %v2199_v34  ;;  %v1395_v54 = vmax.f32 %v2638_v0, %v1375_v52  ;;  %v1450_v0 = vrot.slane %v1398_v60, %v2734_v37 }
 0x129   : > { %v1438_v45 = vrot.slane %v1395_v54, %v2734_v37 }
 0x12a   : > { %2050 = vmatmul.mubr.f32.vlgmr.msra.gmra.mrb[6].mxu1 %v968_v48  ;;  %v1383_v59 = vpop.permute.xlu1 %1382  ;;  %v1760_v48 = vld [vmem:[%s2820_s9] ss:$0 sm:$0xff] }
 0x12b   : > { %v1460_v62 = vsel %vm1459_vm9, %v1438_v45, %v1458_v55  ;;  %v1399_v61 = vmax.f32 %v2644_v4, %v1383_v59  ;;  %v1750_v4 = vld [vmem:[%s2818_s7] ss:$0 sm:$0xff]  ;;  %v1245_v53 = vcombine.high %v1760_v48, %v1760_v48  ;;  %v1252_v55 = vrot.slane %v1760_v48, %v2612_v41 }
 0x12c   : > { %v1462_v63 = vsel %vm1461_vm10, %v1442_v58, %v1460_v62  ;;  %v1219_v59 = vrot.slane %v1209_v51, 1 }
 0x12d   : > { %v1464_v1 = vsel %vm1463_vm11, %v1446_v57, %v1462_v63  ;;  %v1454_v5 = vrot.slane %v1399_v61, %v2734_v37  ;;  %v1259_v57 = vrot.slane %v1245_v53, %v2612_v41  ;;  %v1221_v63 = vrot.slane %v1216_v44, 1 }
 0x12e   : > { %v1466_v6 = vsel %vm1465_vm12, %v1450_v0, %v1464_v1  ;;  %v1217_v0 = vcombine.high %v1209_v51, %v1209_v51 }
 0x12f   : > { %v1468_v2 = vsel %vm1467_vm13, %v1454_v5, %v1466_v6 }
 0x130   : > { %2069 = vmatmul.mubr.msk.f32.vlgmr.msra.gmra.mrb[14].mxu0 %vm1469_vm14, %v1468_v2  ;;  %v1262_v2 = vrot.slane %v1252_v55, 1 }
 0x1eb   : > { %v1981_v7 = vpop.f32.mrb[12].mxu0 }
 0x1ec   : > { %v883_v8 = vpop.f32.mrb[13].mxu0 }
 0x1fd   : > { %v2051_v26 = vpop.f32.mrb[6].mxu1 }
 0x1fe   : > { %v2216_v9 = vadd.f32 %v2051_v26, %v1981_v7  ;;  %v1052_v10 = vpop.f32.mrb[7].mxu1  ;;  %v1264_v26 = vrot.slane %v1259_v57, 1 }
 0x1ff   : > { %v2217_v12 = vadd.f32 %v1052_v10, %v883_v8  ;;  %v1260_v8 = vcombine.high %v1252_v55, %v1252_v55  ;;  %v1218_v10 = vcombine.high %v1216_v44, %v1216_v44 }
 0x200   : > { %v1071_v13 = vadd.f32 %v2216_v9, %v1750_v4 }
 0x201   : > { %v1070_v14 = vadd.f32 %v2217_v12, %v1750_v4 }
 0x202   : > { %v1098_v15 = vrot.slane %v1071_v13, %v2612_v41  ;;  %v1091_v18 = vcombine.high %v1071_v13, %v1071_v13 }
 0x203   : > { %v1074_v16 = vcombine.high %v1070_v14, %v1070_v14  ;;  %v1081_v17 = vrot.slane %v1070_v14, %v2612_v41  ;;  %v2766_v32 = vpop.f32.mrb[14].mxu0 }
 0x204   : > { %v1755_v19 = vrot.slane %v1098_v15, 9  ;;  %v1106_v20 = vcombine.high %v1098_v15, %v1098_v15  ;;  %v1105_v27 = vrot.slane %v1091_v18, %v2612_v41  ;;  %v2070_v33 = vpop.f32.mrb[15].mxu0  ;;  %v1261_v18 = vcombine.high %v1259_v57, %v1259_v57 }
 0x205   : > { %v1088_v21 = vrot.slane %v1074_v16, %v2612_v41  ;;  %v1089_v22 = vcombine.high %v1081_v17, %v1081_v17  ;;  %v1751_v25 = vrot.slane %v1081_v17, 9  ;;  %v1220_v41 = vrot.slane %v1217_v0, 1 }
 0x206   : > { %v1144_v23 = vmax.f32 %v1098_v15, %v1755_v19  ;;  %v1756_v24 = vrot.slane %v1106_v20, 9  ;;  %v1107_v36 = vcombine.high %v1105_v27, %v1105_v27  ;;  %v1757_v39 = vrot.slane %v1105_v27, 9 }
 0x207   : > { %v1752_v29 = vrot.slane %v1089_v22, 9  ;;  %v1090_v30 = vcombine.high %v1088_v21, %v1088_v21  ;;  %v1140_v11 = vmax.f32 %v1081_v17, %v1751_v25  ;;  %v1753_v31 = vrot.slane %v1088_v21, 9 }
 0x208   : > { %1164 = vrot.lane.b32.xlu0 %v1144_v23, %s2284_s30  ;;  %v1145_v28 = vmax.f32 %v1106_v20, %v1756_v24  ;;  %v1758_v43 = vrot.slane %v1107_v36, 9  ;;  %v1146_v46 = vmax.f32 %v1105_v27, %v1757_v39  ;;  %v1222_v27 = vrot.slane %v1218_v10, 1 }
 0x209   : > { %v1141_v34 = vmax.f32 %v1089_v22, %v1752_v29  ;;  %v1754_v35 = vrot.slane %v1090_v30, 9  ;;  %v1142_v38 = vmax.f32 %v1088_v21, %v1753_v31  ;;  %v1263_v21 = vrot.slane %v1260_v8, 1 }
 0x20a   : > { %1166 = vrot.lane.b32.xlu1 %v1145_v28, %s2284_s30  ;;  %v1147_v47 = vmax.f32 %v1107_v36, %v1758_v43  ;;  %v1265_v36 = vrot.slane %v1261_v18, 1 }
 0x20b   : > { %v1143_v42 = vmax.f32 %v1090_v30, %v1754_v35 }
 0x20c   : > { %1156 = vrot.lane.b32.xlu0 %v1140_v11, %s2284_s30 }
 0x20e   : > { %1158 = vrot.lane.b32.xlu1 %v1141_v34, %s2284_s30 }
 0x210   : > { %1160 = vrot.lane.b32.xlu0 %v1142_v38, %s2284_s30 }
 0x212   : > { %1162 = vrot.lane.b32.xlu1 %v1143_v42, %s2284_s30 }
 0x214   : > { %1168 = vrot.lane.b32.xlu0 %v1146_v46, %s2284_s30 }
 0x216   : > { %1170 = vrot.lane.b32.xlu1 %v1147_v47, %s2284_s30 }
 0x27a   : > { %v1165_v49 = vpop.permute.xlu0 %1164 }
 0x27b   : > { %v1184_v52 = vmax.f32 %v1144_v23, %v1165_v49 }
 0x27c   : > { %v1167_v50 = vpop.permute.xlu1 %1166 }
 0x27d   : > { %v1185_v54 = vmax.f32 %v1145_v28, %v1167_v50  ;;  %v1192_v61 = vmax.f32 %v1184_v52, 0.0  ;;  %v1771_v52 = vld [vmem:[%s2821_s10] ss:$0 sm:$0xff] }
 0x27e   : > { %v1157_v58 = vpop.permute.xlu0 %1156 }
 0x27f   : > { %v1180_v56 = vmax.f32 %v1140_v11, %v1157_v58  ;;  %v1193_v1 = vmax.f32 %v1185_v54, 0.0  ;;  %v1235_v15 = vmul.f32 %v1216_v44, %v1192_v61 }
 0x280   : > { %v1159_v45 = vpop.permute.xlu1 %1158 }
 0x281   : > { %v1188_v60 = vmax.f32 %v1180_v56, 0.0  ;;  %v1181_v62 = vmax.f32 %v1141_v34, %v1159_v45  ;;  %v1236_v16 = vmul.f32 %v1221_v63, %v1193_v1  ;;  %v1278_v33 = vadd.f32 %v1259_v57, %v1235_v15 }
 0x282   : > { %v1161_v5 = vpop.permute.xlu0 %1160  ;;  %v1543_v56 = vadd.f32 %v1771_v52, %v2766_v32 }
 0x283   : > { %v1231_v6 = vmul.f32 %v1209_v51, %v1188_v60  ;;  %v1189_v7 = vmax.f32 %v1181_v62, 0.0  ;;  %v1182_v4 = vmax.f32 %v1142_v38, %v1161_v5  ;;  %v1279_v34 = vadd.f32 %v1264_v26, %v1236_v16 }
 0x284   : > { %v1163_v9 = vpop.permute.xlu1 %1162  ;;  %v1573_v49 = vrot.slane %v1278_v33, %v2734_v37 }
 0x285   : > { %v1274_v12 = vadd.f32 %v1252_v55, %v1231_v6  ;;  %v1232_v13 = vmul.f32 %v1219_v59, %v1189_v7  ;;  %v1183_v14 = vmax.f32 %v1143_v42, %v1163_v9  ;;  %v1190_v17 = vmax.f32 %v1182_v4, 0.0 }
 0x286   : > { %v1169_v19 = vpop.permute.xlu0 %1168  ;;  %v1577_v53 = vrot.slane %v1279_v34, %v2734_v37 }
 0x287   : > { %v1275_v20 = vadd.f32 %v1262_v2, %v1232_v13  ;;  %v1191_v22 = vmax.f32 %v1183_v14, 0.0  ;;  %v1186_v23 = vmax.f32 %v1146_v46, %v1169_v19  ;;  %v1557_v24 = vrot.slane %v1274_v12, %v2734_v37 }
 0x288   : > { %v1233_v25 = vmul.f32 %v1217_v0, %v1190_v17  ;;  %v1171_v28 = vpop.permute.xlu1 %1170 }
 0x289   : > { %v1561_v29 = vrot.slane %v1275_v20, %v2734_v37  ;;  %v1234_v30 = vmul.f32 %v1220_v41, %v1191_v22  ;;  %v1194_v11 = vmax.f32 %v1186_v23, 0.0  ;;  %v1187_v31 = vmax.f32 %v1147_v47, %v1171_v28 }
 0x28a   : > { %v1276_v35 = vadd.f32 %v1260_v8, %v1233_v25 }
 0x28b   : > { %v1586_v38 = vsel %vm1455_vm7, %v1561_v29, %v1557_v24  ;;  %v1277_v39 = vadd.f32 %v1263_v21, %v1234_v30  ;;  %v1237_v42 = vmul.f32 %v1218_v10, %v1194_v11  ;;  %v1195_v43 = vmax.f32 %v1187_v31, 0.0 }
 0x28c   : > { %v1565_v46 = vrot.slane %v1276_v35, %v2734_v37 }
 0x28d   : > { %v1569_v3 = vrot.slane %v1277_v39, %v2734_v37  ;;  %v1280_v48 = vadd.f32 %v1261_v18, %v1237_v42  ;;  %v1238_v40 = vmul.f32 %v1222_v27, %v1195_v43 }
 0x28e   : > { %v1587_v47 = vsel %vm1457_vm8, %v1565_v46, %v1586_v38 }
 0x28f   : > { %v1588_v50 = vsel %vm1459_vm9, %v1569_v3, %v1587_v47  ;;  %v1581_v51 = vrot.slane %v1280_v48, %v2734_v37  ;;  %v1281_v44 = vadd.f32 %v1265_v36, %v1238_v40 }
 0x290   : > { %v1589_v54 = vsel %vm1461_vm10, %v1573_v49, %v1588_v50 }
 0x291   : > { %v1585_v58 = vrot.slane %v1281_v44, %v2734_v37  ;;  %v1590_v55 = vsel %vm1463_vm11, %v1577_v53, %v1589_v54 }
 0x292   : > { %v1591_v57 = vsel %vm1465_vm12, %v1581_v51, %v1590_v55 }
 0x293   : > { %v1592_v45 = vsel %vm1467_vm13, %v1585_v58, %v1591_v57 }
 0x294   : > { %v1594_v60 = vadd.f32 %v1592_v45, %v1543_v56 }
 0x296   : > { %1595 = vst.msk [vmem:[%s404_s24] sm:$0xff] %vm432_vm1, %v1594_v60 }
 0x297 PF: > { %s21_s19 = sadd.s32 1, %s2276_s19   ;;  %s2823_s17 = smov %s2272_s18 }
 0x298   : > { %p18_p5 = scmp.ge.s32.totalorder %s21_s19, 4   ;;  %s2824_s18 = smov %s2826_s20 }
 0x29a   :  { %20 = sbr.rel (!%p18_p5) target bundleno = 2 (0x2), region = 101 }

</bundles_post_ra>
